<compile_context>
chip_gen: v5e
topology: v5e:2x2
jax: 0.10.0
libtpu: 0.0.40
codegen_flags: <defaults>
</compile_context>

<pallas_src>
import math

import numpy as np
import jax
import jax.numpy as jnp
from jax import lax
from jax.experimental import pallas as pl
from jax.experimental.pallas import tpu as pltpu


# ----------------------------------------------------------------------------
# Helpers
# ----------------------------------------------------------------------------
def _pick_q_tile(T, max_q_tile):
    """Pick a query-tile width (multiple of 128 dividing T) and the tile count."""
    if max_q_tile is None or T <= max(int(max_q_tile), 128):
        return T, 1
    for cand in range((int(max_q_tile) // 128) * 128, 127, -128):
        if T % cand == 0:
            return cand, T // cand
    # TODO(synk): pad ragged T (not a multiple of 128) so it can still be query-tiled.
    return T, 1


# ----------------------------------------------------------------------------
# Kernel
# ----------------------------------------------------------------------------
def _make_attention_block_kernel(C, T, n_heads, eps, mm_dtype, tq, n_qt):
    ch = C // n_heads
    scale2 = 1.0 / math.sqrt(ch)        # (q*s).(k*s) == q*(s*s) . k  -> fold into q only
    f32 = jnp.float32

    def attention_tile(hatt_ref, k_mm, v_mm, q_tile, h, off, cur_tq):
        # Scores in (T_s, tq) layout so softmax stats are (1, tq) row vectors that
        # broadcast against the (ch, tq) head output with no relayout.
        att = lax.dot_general(k_mm, q_tile, (((0,), (0,)), ((), ())),
                              preferred_element_type=f32)                  # (T, tq)
        att = att - jnp.max(att, axis=0, keepdims=True)
        p = jnp.exp(att)                                                   # unnormalized
        denom = jnp.sum(p, axis=0, keepdims=True)                          # (1, tq)
        a = lax.dot_general(v_mm, p.astype(mm_dtype), (((1,), (0,)), ((), ())),
                            preferred_element_type=f32)                    # (ch, tq)
        # Deferred softmax normalization: O(ch*tq) multiplies, not O(T*tq) divides.
        a = a * pl.reciprocal(denom)
        hatt_ref[pl.ds(h * ch, ch), pl.ds(off, cur_tq)] = a.astype(mm_dtype)

    def kernel(gmat_ref, wqkv_ref, bqkv_ref, wproj_ref, bproj_ref,
               x_ref, o_ref, hatt_ref, *qscr):
        xf = x_ref[0].astype(f32)                                          # (C, T)

        # ---- GroupNorm32 stats: reduce over T first, then a tiny group matmul.
        s1 = jnp.sum(xf, axis=1, keepdims=True)                            # (C, 1)
        s2 = jnp.sum(xf * xf, axis=1, keepdims=True)                       # (C, 1)
        # gmat rows already carry 1/(group_size*T); broadcast keeps the matmul's
        # minor dim at one full lane tile (128) -> only C*C*128 flops per stat.
        mean = jnp.dot(gmat_ref[...], jnp.broadcast_to(s1, (C, 128)),
                       preferred_element_type=f32)[:, 0:1]                 # (C, 1)
        ex2 = jnp.dot(gmat_ref[...], jnp.broadcast_to(s2, (C, 128)),
                      preferred_element_type=f32)[:, 0:1]                  # (C, 1)
        var = ex2 - mean * mean     # one-pass var (f32); fine at current tolerance
        # GroupNorm affine (gamma, beta) is folded into wqkv / bqkv in the wrapper.
        xn = ((xf - mean) * lax.rsqrt(var + eps)).astype(mm_dtype)

        # ---- qkv projection: (3C, C) @ (C, T) on the MXU, f32 accumulation.
        qkv = (jnp.dot(wqkv_ref[...], xn, preferred_element_type=f32)
               + bqkv_ref[...]).astype(mm_dtype)                           # (3C, T)

        # ---- per-head attention; query-tiled so live set is O(T*tq), not O(T^2).
        for h in range(n_heads):                     # n_heads is small (1..8)
            base = 3 * ch * h
            q_mm = qkv[base:base + ch, :] * scale2
            k_mm = qkv[base + ch:base + 2 * ch, :]
            v_mm = qkv[base + 2 * ch:base + 3 * ch, :]
            if n_qt == 1:
                attention_tile(hatt_ref, k_mm, v_mm, q_mm, h, 0, T)
            else:
                qscr_ref = qscr[0]
                qscr_ref[pl.ds(h * ch, ch), :] = q_mm

                @pl.loop(0, n_qt)
                def _(qi, h=h, k_mm=k_mm, v_mm=v_mm, qscr_ref=qscr_ref):
                    off = pl.multiple_of(qi * tq, 128)
                    q_t = qscr_ref[pl.ds(h * ch, ch), pl.ds(off, tq)]
                    attention_tile(hatt_ref, k_mm, v_mm, q_t, h, off, tq)

        # ---- output projection (one K=C matmul over the head scratch) + residual.
        h_proj = (jnp.dot(wproj_ref[...], hatt_ref[...],
                          preferred_element_type=f32) + bproj_ref[...])    # (C, T)
        o_ref[0] = (x_ref[0].astype(f32) + h_proj).astype(o_ref.dtype)

    return kernel


# ----------------------------------------------------------------------------
# Wrapper
# ----------------------------------------------------------------------------
def attention_block_forward(x, norm_w, norm_b, qkv_w, qkv_b, proj_w, proj_b, *,
                            n_heads, n_groups, eps=1e-5, matmul_dtype=None,
                            max_q_tile=512):
    B, C = int(x.shape[0]), int(x.shape[1])
    spatial = x.shape[2:]
    T = int(np.prod(spatial)) if len(spatial) else 1
    assert C % n_heads == 0 and C % n_groups == 0
    mm_dtype = jnp.dtype(x.dtype) if matmul_dtype is None else jnp.dtype(matmul_dtype)
    x_r = x.reshape(B, C, T)

    # Hoisted constant: same-group one-hot matrix with 1/(group_size*T) baked in.
    cg = C // n_groups
    cidx = np.arange(C)
    gmat_np = (cidx[:, None] // cg == cidx[None, :] // cg).astype(np.float32)
    gmat = jnp.asarray(gmat_np / float(cg * T))

    gamma = norm_w.astype(jnp.float32).reshape(C)
    beta = norm_b.astype(jnp.float32).reshape(C)
    wqkv = qkv_w.reshape(3 * C, C).astype(jnp.float32)
    bqkv = qkv_b.astype(jnp.float32).reshape(3 * C)
    # Fold the GroupNorm affine into the qkv projection (free at trace time):
    #   W' = W * gamma (per input column),  b' = b + W @ beta
    wqkv_f = (wqkv * gamma[None, :]).astype(mm_dtype)
    bqkv_f = (bqkv + jnp.einsum("oc,c->o", wqkv, beta,
                                precision=lax.Precision.HIGHEST)).reshape(3 * C, 1)
    wproj = proj_w.reshape(C, C).astype(mm_dtype)
    bproj = proj_b.astype(jnp.float32).reshape(C, 1)

    tq, n_qt = _pick_q_tile(T, max_q_tile)
    kernel = _make_attention_block_kernel(C, T, n_heads, eps, mm_dtype, tq, n_qt)

    scratch = [pltpu.VMEM((C, T), mm_dtype)]                # h_att staging (no concat)
    if n_qt > 1:
        scratch.append(pltpu.VMEM((C, T), mm_dtype))        # scaled-q staging for tiles

    # VMEM budget hint sized to the real working set (review item 3).
    mm_sz = jnp.dtype(mm_dtype).itemsize
    x_sz = jnp.dtype(x.dtype).itemsize
    est = (2 * (C * C * 4 + 4 * C * C * mm_sz + 4 * C * 4)          # const inputs (2 bufs)
           + 2 * 2 * C * T * x_sz                                   # x / out (2 bufs each)
           + len(scratch) * C * T * mm_sz                           # scratches
           + 4 * C * T + 3 * C * T * mm_sz                          # xf + qkv
           + 2 * T * tq * 4 + 3 * (C // n_heads) * tq * 4)          # attention tile temps
    vmem_limit = int(min(100 * 2 ** 20, max(32 * 2 ** 20, 2 * est)))

    def const_spec(shape):
        return pl.BlockSpec(shape, lambda b: (0,) * len(shape))
    # TODO(synk): constant-index weight blocks are still double-buffered by the
    #             default pipeliner; pl.Buffered(1) would halve that.

    out = pl.pallas_call(
        kernel,
        out_shape=jax.ShapeDtypeStruct((B, C, T), x.dtype),
        grid=(B,),
        in_specs=[
            const_spec((C, C)),                                  # gmat (group mean matrix)
            const_spec((3 * C, C)),                              # folded qkv weight
            const_spec((3 * C, 1)),                              # folded qkv bias
            const_spec((C, C)),                                  # proj weight
            const_spec((C, 1)),                                  # proj bias
            pl.BlockSpec((1, C, T), lambda b: (b, 0, 0)),        # x
        ],
        out_specs=pl.BlockSpec((1, C, T), lambda b: (b, 0, 0)),
        scratch_shapes=scratch,
        compiler_params=pltpu.CompilerParams(
            dimension_semantics=("parallel",),
            vmem_limit_bytes=vmem_limit),
    )(gmat, wqkv_f, bqkv_f, wproj, bproj, x_r)
    return out.reshape(x.shape)


class AttentionBlockPallas:
    """Pallas port of AttentionBlock (GroupNorm + qkv + attention + proj + residual)."""

    def __init__(self, name="attentionblock", n_channels=1, n_heads=1, n_groups=32,
                 key=None, dtype=jnp.float32, matmul_dtype=None, max_q_tile=512):
        assert n_channels % n_heads == 0
        assert n_channels % n_groups == 0
        self.name = name
        self.n_channels = n_channels
        self.n_heads = n_heads
        self.n_groups = n_groups
        self.matmul_dtype = matmul_dtype
        self.max_q_tile = max_q_tile
        C = n_channels
        key = jax.random.PRNGKey(0) if key is None else key
        kw, kb = jax.random.split(key)
        # GroupNorm affine params (PyTorch default init: weight=1, bias=0).
        self.norm_weight = jnp.ones((C,), dtype)
        self.norm_bias = jnp.zeros((C,), dtype)
        # qkv 1x1 Conv1d (PyTorch default: U(-1/sqrt(fan_in), 1/sqrt(fan_in))).
        bound = 1.0 / math.sqrt(C)
        self.qkv_weight = jax.random.uniform(kw, (3 * C, C), dtype, -bound, bound)
        self.qkv_bias = jax.random.uniform(kb, (3 * C,), dtype, -bound, bound)
        # proj_out is zero-initialized in the reference (zero_module).
        self.proj_weight = jnp.zeros((C, C), dtype)
        self.proj_bias = jnp.zeros((C,), dtype)

    def __call__(self, x):
        assert x.shape[1] == self.n_channels
        out = attention_block_forward(
            x, self.norm_weight, self.norm_bias,
            self.qkv_weight, self.qkv_bias,
            self.proj_weight, self.proj_bias,
            n_heads=self.n_heads, n_groups=self.n_groups,
            matmul_dtype=self.matmul_dtype, max_q_tile=self.max_q_tile)
        # TODO(synk): in-kernel intermediates (x_nzd, qkv, h_att, h_proj) are not
        # exported to HBM (would defeat the fusion); only cheap ones returned.
        inter = {"x": x, "x_rsh": x.reshape(x.shape[0], x.shape[1], -1), "out": out}
        return out, inter


# ----------------------------------------------------------------------------
# Reference (pure JAX) for verification
# ----------------------------------------------------------------------------
def _ref_attention_block(x, norm_w, norm_b, qkv_w, qkv_b, proj_w, proj_b,
                         n_heads, n_groups, eps=1e-5):
    hp = lax.Precision.HIGHEST
    B, C = x.shape[:2]
    T = int(np.prod(x.shape[2:]))
    xr = x.reshape(B, C, T)
    xf = xr.astype(jnp.float32)
    xg = xf.reshape(B, n_groups, (C // n_groups) * T)
    mu = jnp.mean(xg, axis=-1, keepdims=True)
    var = jnp.var(xg, axis=-1, keepdims=True)
    xn = ((xg - mu) * lax.rsqrt(var + eps)).reshape(B, C, T)
    xn = xn * norm_w.astype(jnp.float32)[None, :, None] \
         + norm_b.astype(jnp.float32)[None, :, None]
    xn = xn.astype(x.dtype)
    qkv = jnp.einsum("oc,bct->bot", qkv_w, xn, precision=hp) + qkv_b[None, :, None]
    ch = C // n_heads
    qkv_h = qkv.reshape(B * n_heads, 3 * ch, T)
    q, k, v = qkv_h[:, :ch], qkv_h[:, ch:2 * ch], qkv_h[:, 2 * ch:]
    scale = 1.0 / math.sqrt(math.sqrt(ch))
    w = jnp.einsum("bct,bcs->bts", q * scale, k * scale, precision=hp)
    w = jax.nn.softmax(w.astype(jnp.float32), axis=-1).astype(w.dtype)
    a = jnp.einsum("bts,bcs->bct", w, v, precision=hp)
    h_att = a.reshape(B, C, T)
    h_proj = jnp.einsum("oc,bct->bot", proj_w, h_att, precision=hp) + proj_b[None, :, None]
    return (xr + h_proj).reshape(x.shape)


if __name__ == "__main__":
    key = jax.random.PRNGKey(0)
    ks = jax.random.split(key, 8)

    # --- cases 1 & 2: small block, single query tile (T = 64) ----------------
    B, C, Wd, Hd = 2, 32, 8, 8
    n_heads, n_groups = 4, 8
    x = jax.random.normal(ks[0], (B, C, Wd, Hd), jnp.float32)
    blk = AttentionBlockPallas(n_channels=C, n_heads=n_heads, n_groups=n_groups, key=ks[1])

    # 1) faithful default params: proj_out is zero-initialized => out == x.
    out0, _ = blk(x)
    jax.block_until_ready(out0)
    np.testing.assert_allclose(np.asarray(out0), np.asarray(x), rtol=1e-6, atol=1e-6)

    # 2) non-trivial params on every branch (norm affine, qkv, proj_out).
    bound = 1.0 / math.sqrt(C)
    blk.norm_weight = 1.0 + 0.1 * jax.random.normal(ks[2], (C,), jnp.float32)
    blk.norm_bias = 0.1 * jax.random.normal(ks[3], (C,), jnp.float32)
    blk.proj_weight = jax.random.uniform(ks[4], (C, C), jnp.float32, -bound, bound)
    blk.proj_bias = jax.random.uniform(ks[5], (C,), jnp.float32, -bound, bound)

    out, _ = blk(x)
    jax.block_until_ready(out)
    ref = _ref_attention_block(x, blk.norm_weight, blk.norm_bias,
                               blk.qkv_weight, blk.qkv_bias,
                               blk.proj_weight, blk.proj_bias, n_heads, n_groups)
    np.testing.assert_allclose(np.asarray(out), np.asarray(ref), rtol=2e-3, atol=2e-3)

    # --- case 3: query-tiled path (T = 256, tq = 128, pl.loop) ---------------
    B2, C2, W2, H2 = 1, 64, 16, 16
    nh2, ng2 = 2, 8
    x2 = jax.random.normal(ks[6], (B2, C2, W2, H2), jnp.float32)
    blk2 = AttentionBlockPallas(n_channels=C2, n_heads=nh2, n_groups=ng2, key=ks[7])
    bound2 = 1.0 / math.sqrt(C2)
    blk2.norm_weight = 1.0 + 0.1 * jax.random.normal(ks[2], (C2,), jnp.float32)
    blk2.norm_bias = 0.1 * jax.random.normal(ks[3], (C2,), jnp.float32)
    blk2.proj_weight = jax.random.uniform(ks[4], (C2, C2), jnp.float32, -bound2, bound2)
    blk2.proj_bias = jax.random.uniform(ks[5], (C2,), jnp.float32, -bound2, bound2)
    out2 = attention_block_forward(x2, blk2.norm_weight, blk2.norm_bias,
                                   blk2.qkv_weight, blk2.qkv_bias,
                                   blk2.proj_weight, blk2.proj_bias,
                                   n_heads=nh2, n_groups=ng2, max_q_tile=128)
    jax.block_until_ready(out2)
    ref2 = _ref_attention_block(x2, blk2.norm_weight, blk2.norm_bias,
                                blk2.qkv_weight, blk2.qkv_bias,
                                blk2.proj_weight, blk2.proj_bias, nh2, ng2)
    np.testing.assert_allclose(np.asarray(out2), np.asarray(ref2), rtol=2e-3, atol=2e-3)

    # --- case 4: bf16 matmul operands (f32 accumulation), tiled config -------
    out_bf = attention_block_forward(x2, blk2.norm_weight, blk2.norm_bias,
                                     blk2.qkv_weight, blk2.qkv_bias,
                                     blk2.proj_weight, blk2.proj_bias,
                                     n_heads=nh2, n_groups=ng2, max_q_tile=128,
                                     matmul_dtype=jnp.bfloat16)
    jax.block_until_ready(out_bf)
    np.testing.assert_allclose(np.asarray(out_bf), np.asarray(ref2), rtol=1e-1, atol=1e-1)

    print("KERNEL_OK")
</pallas_src>

<mosaic_0001>
module attributes {stable_mosaic.version = 11 : i64} {
  func.func @kernel(%arg0: i32, %arg1: memref<32x32xf32, #tpu.memory_space<vmem>>, %arg2: memref<96x32xf32, #tpu.memory_space<vmem>>, %arg3: memref<96x1xf32, #tpu.memory_space<vmem>>, %arg4: memref<32x32xf32, #tpu.memory_space<vmem>>, %arg5: memref<32x1xf32, #tpu.memory_space<vmem>>, %arg6: memref<1x32x64xf32, #tpu.memory_space<vmem>>, %arg7: memref<1x32x64xf32, #tpu.memory_space<vmem>>, %arg8: memref<32x64xf32, #tpu.memory_space<vmem>>) attributes {dimension_semantics = [#tpu.dimension_semantics<parallel>], iteration_bounds = array<i64: 2>, scalar_prefetch = 0 : i64, scratch_operands = 1 : i64, tpu.core_type = #tpu.core_type<tc>, window_params = [{pipeline_mode = #tpu.pipeline_mode<synchronous>, transform_indices = @transform_0, window_bounds = array<i64: 32, 32>}, {pipeline_mode = #tpu.pipeline_mode<synchronous>, transform_indices = @transform_1, window_bounds = array<i64: 96, 32>}, {pipeline_mode = #tpu.pipeline_mode<synchronous>, transform_indices = @transform_2, window_bounds = array<i64: 96, 1>}, {pipeline_mode = #tpu.pipeline_mode<synchronous>, transform_indices = @transform_3, window_bounds = array<i64: 32, 32>}, {pipeline_mode = #tpu.pipeline_mode<synchronous>, transform_indices = @transform_4, window_bounds = array<i64: 32, 1>}, {transform_indices = @transform_5, window_bounds = array<i64: 1, 32, 64>}, {transform_indices = @transform_6, window_bounds = array<i64: 1, 32, 64>}]} {
    %c0 = arith.constant 0 : index
    %c0_0 = arith.constant 0 : index
    %c0_1 = arith.constant 0 : index
    %0 = vector.load %arg6[%c0, %c0_0, %c0_1] : memref<1x32x64xf32, #tpu.memory_space<vmem>>, vector<1x32x64xf32>
    %1 = vector.shape_cast %0 : vector<1x32x64xf32> to vector<32x64xf32>
    %cst = arith.constant dense<0.000000e+00> : vector<32xf32>
    %2 = vector.multi_reduction <add>, %1, %cst [1] : vector<32x64xf32> to vector<32xf32>
    %3 = vector.shape_cast %2 : vector<32xf32> to vector<32x1xf32>
    %4 = arith.mulf %1, %1 : vector<32x64xf32>
    %cst_2 = arith.constant dense<0.000000e+00> : vector<32xf32>
    %5 = vector.multi_reduction <add>, %4, %cst_2 [1] : vector<32x64xf32> to vector<32xf32>
    %6 = vector.shape_cast %5 : vector<32xf32> to vector<32x1xf32>
    %c0_3 = arith.constant 0 : index
    %c0_4 = arith.constant 0 : index
    %7 = vector.load %arg1[%c0_3, %c0_4] : memref<32x32xf32, #tpu.memory_space<vmem>>, vector<32x32xf32>
    %8 = vector.shape_cast %3 : vector<32x1xf32> to vector<32x1xf32>
    %9 = vector.broadcast %8 : vector<32x1xf32> to vector<32x128xf32>
    %cst_5 = arith.constant dense<0.000000e+00> : vector<32x128xf32>
    %10 = tpu.matmul %7, %9, %cst_5 {dimension_numbers = #tpu.dot_dimension_numbers<[1], [0], [0], [1], [0, 0, 1, 1], [], []>} : vector<32x32xf32>, vector<32x128xf32>, vector<32x128xf32> -> vector<32x128xf32>
    %11 = vector.extract_strided_slice %10 {offsets = [0, 0], sizes = [32, 1], strides = [1, 1]} : vector<32x128xf32> to vector<32x1xf32>
    %c0_6 = arith.constant 0 : index
    %c0_7 = arith.constant 0 : index
    %12 = vector.load %arg1[%c0_6, %c0_7] : memref<32x32xf32, #tpu.memory_space<vmem>>, vector<32x32xf32>
    %13 = vector.shape_cast %6 : vector<32x1xf32> to vector<32x1xf32>
    %14 = vector.broadcast %13 : vector<32x1xf32> to vector<32x128xf32>
    %cst_8 = arith.constant dense<0.000000e+00> : vector<32x128xf32>
    %15 = tpu.matmul %12, %14, %cst_8 {dimension_numbers = #tpu.dot_dimension_numbers<[1], [0], [0], [1], [0, 0, 1, 1], [], []>} : vector<32x32xf32>, vector<32x128xf32>, vector<32x128xf32> -> vector<32x128xf32>
    %16 = vector.extract_strided_slice %15 {offsets = [0, 0], sizes = [32, 1], strides = [1, 1]} : vector<32x128xf32> to vector<32x1xf32>
    %17 = arith.mulf %11, %11 : vector<32x1xf32>
    %18 = arith.subf %16, %17 : vector<32x1xf32>
    %19 = vector.broadcast %11 : vector<32x1xf32> to vector<32x64xf32>
    %20 = arith.subf %1, %19 : vector<32x64xf32>
    %cst_9 = arith.constant 9.99999974E-6 : f32
    %21 = vector.broadcast %cst_9 : f32 to vector<32x1xf32>
    %22 = arith.addf %18, %21 : vector<32x1xf32>
    %23 = math.rsqrt %22 : vector<32x1xf32>
    %24 = vector.broadcast %23 : vector<32x1xf32> to vector<32x64xf32>
    %25 = arith.mulf %20, %24 : vector<32x64xf32>
    %c0_10 = arith.constant 0 : index
    %c0_11 = arith.constant 0 : index
    %26 = vector.load %arg2[%c0_10, %c0_11] : memref<96x32xf32, #tpu.memory_space<vmem>>, vector<96x32xf32>
    %cst_12 = arith.constant dense<0.000000e+00> : vector<96x64xf32>
    %27 = tpu.matmul %26, %25, %cst_12 {dimension_numbers = #tpu.dot_dimension_numbers<[1], [0], [0], [1], [0, 0, 1, 1], [], []>} : vector<96x32xf32>, vector<32x64xf32>, vector<96x64xf32> -> vector<96x64xf32>
    %c0_13 = arith.constant 0 : index
    %c0_14 = arith.constant 0 : index
    %28 = vector.load %arg3[%c0_13, %c0_14] : memref<96x1xf32, #tpu.memory_space<vmem>>, vector<96x1xf32>
    %29 = vector.broadcast %28 : vector<96x1xf32> to vector<96x64xf32>
    %30 = arith.addf %27, %29 : vector<96x64xf32>
    %31 = vector.extract_strided_slice %30 {offsets = [0, 0], sizes = [8, 64], strides = [1, 1]} : vector<96x64xf32> to vector<8x64xf32>
    %cst_15 = arith.constant 0.353553385 : f32
    %32 = vector.broadcast %cst_15 : f32 to vector<8x64xf32>
    %33 = arith.mulf %31, %32 : vector<8x64xf32>
    %34 = vector.extract_strided_slice %30 {offsets = [8, 0], sizes = [8, 64], strides = [1, 1]} : vector<96x64xf32> to vector<8x64xf32>
    %35 = vector.extract_strided_slice %30 {offsets = [16, 0], sizes = [8, 64], strides = [1, 1]} : vector<96x64xf32> to vector<8x64xf32>
    %cst_16 = arith.constant dense<0.000000e+00> : vector<64x64xf32>
    %36 = tpu.matmul %34, %33, %cst_16 {dimension_numbers = #tpu.dot_dimension_numbers<[0], [0], [1], [1], [0, 1, 1, 1], [], []>} : vector<8x64xf32>, vector<8x64xf32>, vector<64x64xf32> -> vector<64x64xf32>
    %cst_17 = arith.constant dense<0xFF800000> : vector<64xf32>
    %37 = vector.multi_reduction <maximumf>, %36, %cst_17 [0] : vector<64x64xf32> to vector<64xf32>
    %38 = vector.shape_cast %37 : vector<64xf32> to vector<1x64xf32>
    %39 = vector.broadcast %38 : vector<1x64xf32> to vector<64x64xf32>
    %40 = arith.subf %36, %39 : vector<64x64xf32>
    %41 = math.exp %40 : vector<64x64xf32>
    %cst_18 = arith.constant dense<0.000000e+00> : vector<64xf32>
    %42 = vector.multi_reduction <add>, %41, %cst_18 [0] : vector<64x64xf32> to vector<64xf32>
    %43 = vector.shape_cast %42 : vector<64xf32> to vector<1x64xf32>
    %cst_19 = arith.constant dense<0.000000e+00> : vector<8x64xf32>
    %44 = tpu.matmul %35, %41, %cst_19 {dimension_numbers = #tpu.dot_dimension_numbers<[1], [0], [0], [1], [0, 0, 1, 1], [], []>} : vector<8x64xf32>, vector<64x64xf32>, vector<8x64xf32> -> vector<8x64xf32>
    %45 = tpu.reciprocal %43 : vector<1x64xf32> -> vector<1x64xf32>
    %46 = vector.broadcast %45 : vector<1x64xf32> to vector<8x64xf32>
    %47 = arith.mulf %44, %46 : vector<8x64xf32>
    %c0_20 = arith.constant 0 : index
    %c0_21 = arith.constant 0 : index
    %48 = vector.load %arg8[%c0_20, %c0_21] : memref<32x64xf32, #tpu.memory_space<vmem>>, vector<8x64xf32>
    tpu.vector_store %arg8[%c0_20, %c0_21], %47 {strides = array<i32>} : memref<32x64xf32, #tpu.memory_space<vmem>>, vector<8x64xf32>,
    %49 = vector.extract_strided_slice %30 {offsets = [24, 0], sizes = [8, 64], strides = [1, 1]} : vector<96x64xf32> to vector<8x64xf32>
    %cst_22 = arith.constant 0.353553385 : f32
    %50 = vector.broadcast %cst_22 : f32 to vector<8x64xf32>
    %51 = arith.mulf %49, %50 : vector<8x64xf32>
    %52 = vector.extract_strided_slice %30 {offsets = [32, 0], sizes = [8, 64], strides = [1, 1]} : vector<96x64xf32> to vector<8x64xf32>
    %53 = vector.extract_strided_slice %30 {offsets = [40, 0], sizes = [8, 64], strides = [1, 1]} : vector<96x64xf32> to vector<8x64xf32>
    %cst_23 = arith.constant dense<0.000000e+00> : vector<64x64xf32>
    %54 = tpu.matmul %52, %51, %cst_23 {dimension_numbers = #tpu.dot_dimension_numbers<[0], [0], [1], [1], [0, 1, 1, 1], [], []>} : vector<8x64xf32>, vector<8x64xf32>, vector<64x64xf32> -> vector<64x64xf32>
    %cst_24 = arith.constant dense<0xFF800000> : vector<64xf32>
    %55 = vector.multi_reduction <maximumf>, %54, %cst_24 [0] : vector<64x64xf32> to vector<64xf32>
    %56 = vector.shape_cast %55 : vector<64xf32> to vector<1x64xf32>
    %57 = vector.broadcast %56 : vector<1x64xf32> to vector<64x64xf32>
    %58 = arith.subf %54, %57 : vector<64x64xf32>
    %59 = math.exp %58 : vector<64x64xf32>
    %cst_25 = arith.constant dense<0.000000e+00> : vector<64xf32>
    %60 = vector.multi_reduction <add>, %59, %cst_25 [0] : vector<64x64xf32> to vector<64xf32>
    %61 = vector.shape_cast %60 : vector<64xf32> to vector<1x64xf32>
    %cst_26 = arith.constant dense<0.000000e+00> : vector<8x64xf32>
    %62 = tpu.matmul %53, %59, %cst_26 {dimension_numbers = #tpu.dot_dimension_numbers<[1], [0], [0], [1], [0, 0, 1, 1], [], []>} : vector<8x64xf32>, vector<64x64xf32>, vector<8x64xf32> -> vector<8x64xf32>
    %63 = tpu.reciprocal %61 : vector<1x64xf32> -> vector<1x64xf32>
    %64 = vector.broadcast %63 : vector<1x64xf32> to vector<8x64xf32>
    %65 = arith.mulf %62, %64 : vector<8x64xf32>
    %c8 = arith.constant 8 : index
    %c0_27 = arith.constant 0 : index
    %66 = vector.load %arg8[%c8, %c0_27] : memref<32x64xf32, #tpu.memory_space<vmem>>, vector<8x64xf32>
    tpu.vector_store %arg8[%c8, %c0_27], %65 {strides = array<i32>} : memref<32x64xf32, #tpu.memory_space<vmem>>, vector<8x64xf32>,
    %67 = vector.extract_strided_slice %30 {offsets = [48, 0], sizes = [8, 64], strides = [1, 1]} : vector<96x64xf32> to vector<8x64xf32>
    %cst_28 = arith.constant 0.353553385 : f32
    %68 = vector.broadcast %cst_28 : f32 to vector<8x64xf32>
    %69 = arith.mulf %67, %68 : vector<8x64xf32>
    %70 = vector.extract_strided_slice %30 {offsets = [56, 0], sizes = [8, 64], strides = [1, 1]} : vector<96x64xf32> to vector<8x64xf32>
    %71 = vector.extract_strided_slice %30 {offsets = [64, 0], sizes = [8, 64], strides = [1, 1]} : vector<96x64xf32> to vector<8x64xf32>
    %cst_29 = arith.constant dense<0.000000e+00> : vector<64x64xf32>
    %72 = tpu.matmul %70, %69, %cst_29 {dimension_numbers = #tpu.dot_dimension_numbers<[0], [0], [1], [1], [0, 1, 1, 1], [], []>} : vector<8x64xf32>, vector<8x64xf32>, vector<64x64xf32> -> vector<64x64xf32>
    %cst_30 = arith.constant dense<0xFF800000> : vector<64xf32>
    %73 = vector.multi_reduction <maximumf>, %72, %cst_30 [0] : vector<64x64xf32> to vector<64xf32>
    %74 = vector.shape_cast %73 : vector<64xf32> to vector<1x64xf32>
    %75 = vector.broadcast %74 : vector<1x64xf32> to vector<64x64xf32>
    %76 = arith.subf %72, %75 : vector<64x64xf32>
    %77 = math.exp %76 : vector<64x64xf32>
    %cst_31 = arith.constant dense<0.000000e+00> : vector<64xf32>
    %78 = vector.multi_reduction <add>, %77, %cst_31 [0] : vector<64x64xf32> to vector<64xf32>
    %79 = vector.shape_cast %78 : vector<64xf32> to vector<1x64xf32>
    %cst_32 = arith.constant dense<0.000000e+00> : vector<8x64xf32>
    %80 = tpu.matmul %71, %77, %cst_32 {dimension_numbers = #tpu.dot_dimension_numbers<[1], [0], [0], [1], [0, 0, 1, 1], [], []>} : vector<8x64xf32>, vector<64x64xf32>, vector<8x64xf32> -> vector<8x64xf32>
    %81 = tpu.reciprocal %79 : vector<1x64xf32> -> vector<1x64xf32>
    %82 = vector.broadcast %81 : vector<1x64xf32> to vector<8x64xf32>
    %83 = arith.mulf %80, %82 : vector<8x64xf32>
    %c16 = arith.constant 16 : index
    %c0_33 = arith.constant 0 : index
    %84 = vector.load %arg8[%c16, %c0_33] : memref<32x64xf32, #tpu.memory_space<vmem>>, vector<8x64xf32>
    tpu.vector_store %arg8[%c16, %c0_33], %83 {strides = array<i32>} : memref<32x64xf32, #tpu.memory_space<vmem>>, vector<8x64xf32>,
    %85 = vector.extract_strided_slice %30 {offsets = [72, 0], sizes = [8, 64], strides = [1, 1]} : vector<96x64xf32> to vector<8x64xf32>
    %cst_34 = arith.constant 0.353553385 : f32
    %86 = vector.broadcast %cst_34 : f32 to vector<8x64xf32>
    %87 = arith.mulf %85, %86 : vector<8x64xf32>
    %88 = vector.extract_strided_slice %30 {offsets = [80, 0], sizes = [8, 64], strides = [1, 1]} : vector<96x64xf32> to vector<8x64xf32>
    %89 = vector.extract_strided_slice %30 {offsets = [88, 0], sizes = [8, 64], strides = [1, 1]} : vector<96x64xf32> to vector<8x64xf32>
    %cst_35 = arith.constant dense<0.000000e+00> : vector<64x64xf32>
    %90 = tpu.matmul %88, %87, %cst_35 {dimension_numbers = #tpu.dot_dimension_numbers<[0], [0], [1], [1], [0, 1, 1, 1], [], []>} : vector<8x64xf32>, vector<8x64xf32>, vector<64x64xf32> -> vector<64x64xf32>
    %cst_36 = arith.constant dense<0xFF800000> : vector<64xf32>
    %91 = vector.multi_reduction <maximumf>, %90, %cst_36 [0] : vector<64x64xf32> to vector<64xf32>
    %92 = vector.shape_cast %91 : vector<64xf32> to vector<1x64xf32>
    %93 = vector.broadcast %92 : vector<1x64xf32> to vector<64x64xf32>
    %94 = arith.subf %90, %93 : vector<64x64xf32>
    %95 = math.exp %94 : vector<64x64xf32>
    %cst_37 = arith.constant dense<0.000000e+00> : vector<64xf32>
    %96 = vector.multi_reduction <add>, %95, %cst_37 [0] : vector<64x64xf32> to vector<64xf32>
    %97 = vector.shape_cast %96 : vector<64xf32> to vector<1x64xf32>
    %cst_38 = arith.constant dense<0.000000e+00> : vector<8x64xf32>
    %98 = tpu.matmul %89, %95, %cst_38 {dimension_numbers = #tpu.dot_dimension_numbers<[1], [0], [0], [1], [0, 0, 1, 1], [], []>} : vector<8x64xf32>, vector<64x64xf32>, vector<8x64xf32> -> vector<8x64xf32>
    %99 = tpu.reciprocal %97 : vector<1x64xf32> -> vector<1x64xf32>
    %100 = vector.broadcast %99 : vector<1x64xf32> to vector<8x64xf32>
    %101 = arith.mulf %98, %100 : vector<8x64xf32>
    %c24 = arith.constant 24 : index
    %c0_39 = arith.constant 0 : index
    %102 = vector.load %arg8[%c24, %c0_39] : memref<32x64xf32, #tpu.memory_space<vmem>>, vector<8x64xf32>
    tpu.vector_store %arg8[%c24, %c0_39], %101 {strides = array<i32>} : memref<32x64xf32, #tpu.memory_space<vmem>>, vector<8x64xf32>,
    %c0_40 = arith.constant 0 : index
    %c0_41 = arith.constant 0 : index
    %103 = vector.load %arg4[%c0_40, %c0_41] : memref<32x32xf32, #tpu.memory_space<vmem>>, vector<32x32xf32>
    %c0_42 = arith.constant 0 : index
    %c0_43 = arith.constant 0 : index
    %104 = vector.load %arg8[%c0_42, %c0_43] : memref<32x64xf32, #tpu.memory_space<vmem>>, vector<32x64xf32>
    %cst_44 = arith.constant dense<0.000000e+00> : vector<32x64xf32>
    %105 = tpu.matmul %103, %104, %cst_44 {dimension_numbers = #tpu.dot_dimension_numbers<[1], [0], [0], [1], [0, 0, 1, 1], [], []>} : vector<32x32xf32>, vector<32x64xf32>, vector<32x64xf32> -> vector<32x64xf32>
    %c0_45 = arith.constant 0 : index
    %c0_46 = arith.constant 0 : index
    %106 = vector.load %arg5[%c0_45, %c0_46] : memref<32x1xf32, #tpu.memory_space<vmem>>, vector<32x1xf32>
    %107 = vector.broadcast %106 : vector<32x1xf32> to vector<32x64xf32>
    %108 = arith.addf %105, %107 : vector<32x64xf32>
    %c0_47 = arith.constant 0 : index
    %c0_48 = arith.constant 0 : index
    %c0_49 = arith.constant 0 : index
    %109 = vector.load %arg6[%c0_47, %c0_48, %c0_49] : memref<1x32x64xf32, #tpu.memory_space<vmem>>, vector<1x32x64xf32>
    %110 = vector.shape_cast %109 : vector<1x32x64xf32> to vector<32x64xf32>
    %111 = arith.addf %110, %108 : vector<32x64xf32>
    %c0_50 = arith.constant 0 : index
    %c0_51 = arith.constant 0 : index
    %c0_52 = arith.constant 0 : index
    %112 = vector.load %arg7[%c0_50, %c0_51, %c0_52] : memref<1x32x64xf32, #tpu.memory_space<vmem>>, vector<1x32x64xf32>
    %113 = vector.shape_cast %112 : vector<1x32x64xf32> to vector<32x64xf32>
    %114 = vector.shape_cast %111 : vector<32x64xf32> to vector<1x32x64xf32>
    tpu.vector_store %arg7[%c0_50, %c0_51, %c0_52], %114 {strides = array<i32>} : memref<1x32x64xf32, #tpu.memory_space<vmem>>, vector<1x32x64xf32>,
    return
  }
  func.func @transform_0(%arg0: i32) -> (i32, i32) {
    %c0_i32 = arith.constant 0 : i32
    %c0_i32_0 = arith.constant 0 : i32
    %c0_i32_1 = arith.constant 0 : i32
    return %c0_i32, %c0_i32_0 : i32, i32
  }
  func.func @transform_1(%arg0: i32) -> (i32, i32) {
    %c0_i32 = arith.constant 0 : i32
    %c0_i32_0 = arith.constant 0 : i32
    %c0_i32_1 = arith.constant 0 : i32
    return %c0_i32, %c0_i32_0 : i32, i32
  }
  func.func @transform_2(%arg0: i32) -> (i32, i32) {
    %c0_i32 = arith.constant 0 : i32
    %c0_i32_0 = arith.constant 0 : i32
    %c0_i32_1 = arith.constant 0 : i32
    return %c0_i32, %c0_i32_0 : i32, i32
  }
  func.func @transform_3(%arg0: i32) -> (i32, i32) {
    %c0_i32 = arith.constant 0 : i32
    %c0_i32_0 = arith.constant 0 : i32
    %c0_i32_1 = arith.constant 0 : i32
    return %c0_i32, %c0_i32_0 : i32, i32
  }
  func.func @transform_4(%arg0: i32) -> (i32, i32) {
    %c0_i32 = arith.constant 0 : i32
    %c0_i32_0 = arith.constant 0 : i32
    %c0_i32_1 = arith.constant 0 : i32
    return %c0_i32, %c0_i32_0 : i32, i32
  }
  func.func @transform_5(%arg0: i32) -> (i32, i32, i32) {
    %c0_i32 = arith.constant 0 : i32
    %c0_i32_0 = arith.constant 0 : i32
    %c0_i32_1 = arith.constant 0 : i32
    return %arg0, %c0_i32, %c0_i32_0 : i32, i32, i32
  }
  func.func @transform_6(%arg0: i32) -> (i32, i32, i32) {
    %c0_i32 = arith.constant 0 : i32
    %c0_i32_0 = arith.constant 0 : i32
    %c0_i32_1 = arith.constant 0 : i32
    return %arg0, %c0_i32, %c0_i32_0 : i32, i32, i32
  }
}

</mosaic_0001>

<bundles_post_ra>
// kernel: tpu_custom_call.1
= control target key start
LH: loop header
LB: loop body
LE: loop exit
PB: predicated region body
PF: predicated region fallthrough
CT: control target
= control target key end

     0   :  { %11 = vsyncpa [#allocation4], 0  ;;  %s2341_s0 = inlined_call_operand.vmem [shape: f32[32,32], index: 0, kind: input, shape index: {}]   ;;  %s2342_s1 = inlined_call_operand.vmem [shape: f32[96,32], index: 1, kind: input, shape index: {}]   ;;  %s2343_s2 = inlined_call_operand.vmem [shape: f32[96,1], index: 2, kind: input, shape index: {}]   ;;  %s2344_s3 = inlined_call_operand.vmem [shape: f32[32,32], index: 3, kind: input, shape index: {}]   ;;  %s2345_s4 = inlined_call_operand.vmem [shape: f32[32,1], index: 4, kind: input, shape index: {}]   ;;  %s2346_s5 = inlined_call_operand.vmem [shape: f32[2,32,64], index: 5, kind: input, shape index: {}]   ;;  %s2347_s6 = inlined_call_operand.hbm [shape: f32[2,32,64], index: 6, kind: output, shape index: {}]  }
   0x1   :  { %13 = vsyncpa [#allocation4 + $0x1], 0  ;;  %s1914_s21 = smov 0   ;;  %s1916_s22 = smov 0  }
   0x2   :  { %s1918_s23 = smov 0   ;;  %s1920_s24 = smov 0  }
   0x3 LB: > { %s1935_s25 = sadd.s32 4294967295, %s1874_s24   ;;  %s1607_s26 = sadd.s32 4294967294, %s1874_s24   ;;  %s1874_s24 = sphi %s1920_s24, %s2353_s24   ;;  %s1870_s23 = sphi %s1918_s23, %s2352_s23   ;;  %s1866_s22 = sphi %s1916_s22, %s2351_s22   ;;  %s1862_s21 = sphi %s1914_s21, %s2350_s21  }
   0x4   : > { %s1939_s27 = sadd.s32 1, %s1874_s24   ;;  %s157_s28 = sadd.s32 1, %s1870_s23 }
   0x5   : > { %s154_s29 = ssub.s32 %s1874_s24, %s1939_s27  ;;  %p167_p0 = scmp.ne.s32.totalorder %s1870_s23, %s1866_s22 }
   0x6   : > { %p155_p1 = scmp.eq.s32.totalorder %s154_s29, 0  ;;  %p168_p2 = scmp.eq.s32.totalorder %s1935_s25, 1 }
   0x7   : > { %p173_p3 = scmp.ne.s32.totalorder %s1866_s22, %s1862_s21  ;;  %p174_p4 = scmp.eq.s32.totalorder %s1607_s26, 1 }
   0x8   : > { %s1950_s30 = scalar_select %p155_p1, %s1870_s23, %s157_s28  }
   0x9   : > { %p1952_p5 = por %p168_p2, %p167_p0  ;;  %p1956_p6 = por %p174_p4, %p173_p3 }
   0xa   : > { %p1610_p7 = scmp.ge.s32.totalorder %s1874_s24, 1  ;;  %p215_p8 = scmp.lt.s32.totalorder %s1874_s24, 3 }
   0xc   : > { %p216_p9 = pnand %p1610_p7, %p215_p8 }
   0xd   : > { %p245_p10 = scmp.lt.s32.totalorder (!%p216_p9), %s1935_s25, 1  ;;  %s242_s16 = sand.u32 (!%p216_p9), 1, %s1866_s22  }
   0xe   : > { %219 = sbr.rel (%p216_p9) target bundleno = 1803 (0x70b), region = 44  ;;  %s1611_s17 = sshll.u32 (!%p216_p9), %s242_s16, 5 }
   0xf   : > { %s244_s18 = scalar_lea.vmem (!%p216_p9), [#allocation3], %s1611_s17  ;;  %s1680_s19 = sshll.u32 (!%p216_p9), %s1935_s25, 5 }
  0x10   : > { %s1541_s28 = scalar_lea.hbm (!%p216_p9), %s2347_s6, %s1680_s19  ;;  %s1542_s29 = sshll.u32 (!%p216_p9), %s244_s18, 4  ;;  %s1543_s29 = int_to_ptr.vmem [resolvable:$true] %s1542_s29 }
  0x11   : > { %s1832_s15 = scalar_lea.hbm (!%p216_p9), %s2347_s6, 64 }
  0x13   : > { %s246_s9 = scalar_select %p245_p10, %s1935_s25, 1  ;;  %vm254_vm0 = vcmask 523264   ;;  %v283_v22 = vld [vmem:[%s2341_s0] sm:$0xff]  ;;  %vm287_vm1 = vcmask 261120   ;;  %v284_v25 = vld [vmem:[%s2341_s0 + $0x8] sm:$0xff]  ;;  %v285_v26 = vld [vmem:[%s2341_s0 + $0x10] sm:$0xff] }
  0x14   : > { %v286_v27 = vld [vmem:[%s2341_s0 + $0x18] sm:$0xff]  ;;  %v1876_v28 = vmov 0   ;;  %v471_v40 = vld [vmem:[%s2343_s2 + $0x8] sm:$0xff]  ;;  %v472_v59 = vld [vmem:[%s2343_s2 + $0x10] sm:$0xff]  ;;  %vm664_vm14 = vcmask 64512   ;;  %s1530_s25 = scalar_lea.sflag [#allocation4], %s242_s16 }
  0x15   : > { %s1679_s10 = sshll.u32 %s246_s9, 5  ;;  %1731 = vset.pattern.permute.xlu1 %v1876_v28  ;;  %1730 = vset.pattern.permute.xlu2 %v1876_v28  ;;  %v473_v49 = vld [vmem:[%s2343_s2 + $0x18] sm:$0xff]  ;;  %s1544_s9 = sshll.u32 %s1541_s28, 4  ;;  %s1545_s9 = int_to_ptr.hbm [resolvable:$true] %s1544_s9 }
  0x16   : > { %s1967_s13 = scalar_lea.vmem %s2346_s5, %s1679_s10  ;;  %1729 = vset.pattern.permute.xlu0 %v1876_v28  ;;  %s1826_s10 = sshra.s32 %s1545_s9, 4  ;;  %s1827_s10 = int_to_ptr.hbm [resolvable:$true] %s1826_s10 }
  0x17   : > { %v1970_v0 = vld [vmem:[%s1967_s13 + $0x18] sm:$0xff]  ;;  %v1973_v1 = vld [vmem:[%s1967_s13 + $0x8] sm:$0xff]  ;;  %v1976_v2 = vld [vmem:[%s1967_s13 + $0x10] sm:$0xff]  ;;  %s1828_s11 = scalar_lea.hbm %s1827_s10, 32  ;;  %p1833_p0 = scmp.lt.s32.totalorder %s1827_s10, %s2347_s6 }
  0x18   : > { %v264_v3 = vsel %vm254_vm0, %v1970_v0, 0.0  ;;  %v258_v4 = vsel %vm254_vm0, %v1973_v1, 0.0  ;;  %v269_v5 = vmul.f32 %v1976_v2, %v1976_v2  ;;  %v270_v7 = vmul.f32 %v1970_v0, %v1970_v0  ;;  %v1988_v8 = vld [vmem:[%s1967_s13] sm:$0xff]  ;;  %p1829_p11 = scmp.ne.s32.totalorder %s1827_s10, %s1828_s11  ;;  %p1834_p1 = scmp.lt.s32.totalorder %s1832_s15, %s1828_s11 }
  0x19   : > { %265 = vadd.xlane.f32.xlu0 %v264_v3  ;;  %259 = vadd.xlane.f32.xlu1 %v258_v4  ;;  %v261_v9 = vsel %vm254_vm0, %v1976_v2, 0.0  ;;  %v255_v11 = vsel %vm254_vm0, %v1988_v8, 0.0  ;;  %v268_v12 = vmul.f32 %v1973_v1, %v1973_v1  ;;  %v267_v13 = vmul.f32 %v1988_v8, %v1988_v8 }
  0x1a   : > { %v277_v6 = vsel %vm254_vm0, %v269_v5, 0.0  ;;  %v280_v10 = vsel %vm254_vm0, %v270_v7, 0.0  ;;  %p1830_p12 = pnand %p1829_p11, %p1952_p5  ;;  %p1835_p2 = por %p1834_p1, %p1833_p0 }
  0x1b   : > { %278 = vadd.xlane.f32.xlu2 %v277_v6  ;;  %v274_v14 = vsel %vm254_vm0, %v268_v12, 0.0  ;;  %v271_v15 = vsel %vm254_vm0, %v267_v13, 0.0 }
  0x1c   : > { %p1831_p13 = pneg %p1830_p12 }
  0x1e   : > { %p1836_p3 = pnand %p1835_p2, %p1831_p13 }
  0x21   : > { %262 = vadd.xlane.f32.xlu0 %v261_v9  ;;  %281 = vadd.xlane.f32.xlu1 %v280_v10 }
  0x23   : > { %256 = vadd.xlane.f32.xlu2 %v255_v11  ;;  %v477_v11 = vld [vmem:[%s2343_s2 + $0x38] sm:$0xff] }
  0x29   : > { %275 = vadd.xlane.f32.xlu0 %v274_v14  ;;  %272 = vadd.xlane.f32.xlu1 %v271_v15 }
  0x8c   : > { %v266_v16 = vpop.xlane.xlu0 %265  ;;  %v260_v17 = vpop.xlane.xlu1 %259 }
  0x8d   : > { %312 = vmatpush.msra.mxu0 %v266_v16 }
  0x8e   : > { %v279_v18 = vpop.xlane.xlu2 %278 }
  0x94   : > { %v263_v19 = vpop.xlane.xlu0 %262  ;;  %v282_v20 = vpop.xlane.xlu1 %281 }
  0x95   : > { %313 = vmatpush.msra.mxu0 %v263_v19  ;;  %341 = vmatpush.msra.mxu1 %v282_v20  ;;  %v475_v19 = vld [vmem:[%s2343_s2 + $0x28] sm:$0xff] }
  0x96   : > { %v257_v21 = vpop.xlane.xlu2 %256 }
  0x97   : > { %314 = vmatpush.msra.mxu0 %v260_v17  ;;  %342 = vmatpush.msra.mxu1 %v279_v18 }
  0x99   : > { %315 = vmatpush.msra.mxu0 %v257_v21  ;;  %v474_v21 = vld [vmem:[%s2343_s2 + $0x20] sm:$0xff] }
  0x9a   : > { %1614 = vmatmul.msk.f32.vlgmr.msra.gmra.mxu0 %vm287_vm1, %v283_v22 }
  0x9c   : > { %v276_v23 = vpop.xlane.xlu0 %275  ;;  %v273_v24 = vpop.xlane.xlu1 %272 }
  0x9d   : > { %343 = vmatpush.msra.mxu1 %v276_v23  ;;  %v476_v23 = vld [vmem:[%s2343_s2 + $0x30] sm:$0xff] }
  0x9f   : > { %344 = vmatpush.msra.mxu1 %v273_v24  ;;  %v470_v24 = vld [vmem:[%s2343_s2] sm:$0xff] }
  0xa0   : > { %1618 = vmatmul.msk.f32.vlgmr.msra.gmra.mxu1 %vm287_vm1, %v283_v22 }
  0xa2   : > { %1615 = vmatmul.msk.f32.gmra.mxu0 %vm287_vm1, %v284_v25 }
  0xa8   : > { %1619 = vmatmul.msk.f32.gmra.mxu1 %vm287_vm1, %v284_v25  ;;  %v480_v25 = vld [vmem:[%s2343_s2 + $0x50] sm:$0xff] }
  0xaa   : > { %1616 = vmatmul.msk.f32.gmra.mxu0 %vm287_vm1, %v285_v26 }
  0xb0   : > { %1620 = vmatmul.msk.f32.gmra.mxu1 %vm287_vm1, %v285_v26  ;;  %v478_v26 = vld [vmem:[%s2343_s2 + $0x40] sm:$0xff] }
  0xb2   : > { %1617 = vmatmul.msk.f32.gmra.mxu0 %vm287_vm1, %v286_v27 }
  0xb8   : > { %1621 = vmatmul.msk.f32.gmra.mxu1 %vm287_vm1, %v286_v27 }
 0x117   : > { %v317_v29 = vpop.f32.mrf.mxu0 }
 0x118   : > { %368 = vperm.xlu1 %1731, %v317_v29   ;;  %v358_v36 = vmul.f32 %v317_v29, %v317_v29 }
 0x11d   : > { %v346_v30 = vpop.f32.mrf.mxu1 }
 0x11e   : > { %v362_v41 = vsub.f32 %v346_v30, %v358_v36 }
 0x11f   : > { %v320_v31 = vpop.f32.mrf.mxu0 }
 0x120   : > { %373 = vperm.xlu2 %1730, %v320_v31   ;;  %v359_v32 = vmul.f32 %v320_v31, %v320_v31  ;;  %v390_v45 = vadd.f32 1e-05, %v362_v41 }
 0x122   : > { %vm400_vm12 = vweird.f32 %v390_v45 }
 0x125   : > { %v349_v33 = vpop.f32.mrf.mxu1 }
 0x126   : > { %v363_v34 = vsub.f32 %v349_v33, %v359_v32 }
 0x127   : > { %v323_v35 = vpop.f32.mrf.mxu0 }
 0x128   : > { %378 = vperm.xlu0 %1729, %v323_v35   ;;  %v391_v37 = vadd.f32 1e-05, %v363_v34  ;;  %v360_v38 = vmul.f32 %v323_v35, %v323_v35 }
 0x12a   : > { %1732 = vrsqrt.f32 %v391_v37  ;;  %vm410_vm7 = vweird.f32 %v391_v37 }
 0x12d   : > { %v352_v39 = vpop.f32.mrf.mxu1 }
 0x12e   : > { %v364_v42 = vsub.f32 %v352_v39, %v360_v38 }
 0x12f   : > { %v326_v43 = vpop.f32.mrf.mxu0 }
 0x130   : > { %v392_v44 = vadd.f32 1e-05, %v364_v42  ;;  %489 = vperm.xlu0 %1729, %v471_v40   ;;  %383 = vperm.xlu2 %1730, %v326_v43   ;;  %v361_v46 = vmul.f32 %v326_v43, %v326_v43  ;;  %v1733_v47 = vpop.eup %1732  ;;  %v462_v43 = vld [vmem:[%s2342_s1 + $0x20] sm:$0xff] }
 0x131   : > { %v405_v51 = vmul.f32 %v1733_v47, %v391_v37  ;;  %vm411_vm5 = vweird.f32 %v1733_v47 }
 0x132   : > { %1734 = vrsqrt.f32 %v392_v44  ;;  %vm420_vm3 = vweird.f32 %v392_v44  ;;  %vm412_vm8 = vmor %vm410_vm7, %vm411_vm5 }
 0x133   : > { %1736 = vrsqrt.f32 %v390_v45  ;;  %v406_v55 = vmul.f32 %v1733_v47, %v405_v51 }
 0x135   : > { %v355_v48 = vpop.f32.mrf.mxu1  ;;  %v407_v61 = vmul.f32 0.5, %v406_v55 }
 0x136   : > { %v365_v50 = vsub.f32 %v355_v48, %v361_v46  ;;  %v465_v46 = vld [vmem:[%s2342_s1 + $0x38] sm:$0xff]  ;;  %v467_v48 = vld [vmem:[%s2342_s1 + $0x48] sm:$0xff] }
 0x137   : > { %v408_v9 = vsub.f32 1.5, %v407_v61 }
 0x138   : > { %v1735_v52 = vpop.eup %1734  ;;  %v393_v53 = vadd.f32 1e-05, %v365_v50  ;;  %499 = vperm.xlu0 %1729, %v473_v49   ;;  %v468_v49 = vld [vmem:[%s2342_s1 + $0x50] sm:$0xff] }
 0x139   : > { %v415_v54 = vmul.f32 %v1735_v52, %v392_v44  ;;  %v1737_v57 = vpop.eup %1736  ;;  %vm421_vm2 = vweird.f32 %v1735_v52  ;;  %v409_v13 = vmul.f32 %v1733_v47, %v408_v9  ;;  %v463_v44 = vld [vmem:[%s2342_s1 + $0x28] sm:$0xff] }
 0x13a   : > { %1738 = vrsqrt.f32 %v393_v53  ;;  %v395_v60 = vmul.f32 %v1737_v57, %v390_v45  ;;  %vm422_vm4 = vmor %vm420_vm3, %vm421_vm2  ;;  %vm430_vm9 = vweird.f32 %v393_v53  ;;  %vm401_vm11 = vweird.f32 %v1737_v57  ;;  %v464_v45 = vld [vmem:[%s2342_s1 + $0x30] sm:$0xff] }
 0x13b   : > { %v416_v56 = vmul.f32 %v1735_v52, %v415_v54  ;;  %v413_v16 = vsel %vm412_vm8, %v1733_v47, %v409_v13  ;;  %vm402_vm13 = vmor %vm400_vm12, %vm401_vm11  ;;  %v466_v47 = vld [vmem:[%s2342_s1 + $0x40] sm:$0xff] }
 0x13c   : > { %v396_v5 = vmul.f32 %v1737_v57, %v395_v60 }
 0x13d   : > { %v417_v58 = vmul.f32 0.5, %v416_v56 }
 0x13e   : > { %v397_v12 = vmul.f32 0.5, %v396_v5 }
 0x13f   : > { %v418_v62 = vsub.f32 1.5, %v417_v58 }
 0x140   : > { %v1739_v63 = vpop.eup %1738  ;;  %494 = vperm.xlu0 %1729, %v472_v59   ;;  %v398_v18 = vsub.f32 1.5, %v397_v12 }
 0x141   : > { %v425_v3 = vmul.f32 %v1739_v63, %v393_v53  ;;  %v419_v4 = vmul.f32 %v1735_v52, %v418_v62  ;;  %vm431_vm6 = vweird.f32 %v1739_v63 }
 0x142   : > { %vm432_vm10 = vmor %vm430_vm9, %vm431_vm6  ;;  %v399_v20 = vmul.f32 %v1737_v57, %v398_v18 }
 0x143   : > { %v426_v6 = vmul.f32 %v1739_v63, %v425_v3  ;;  %v423_v7 = vsel %vm422_vm4, %v1735_v52, %v419_v4 }
 0x144   : > { %446 = vperm.xlu2 %1730, %v423_v7   ;;  %v403_v22 = vsel %vm402_vm13, %v1737_v57, %v399_v20  ;;  %v479_v20 = vld [vmem:[%s2343_s2 + $0x48] sm:$0xff] }
 0x145   : > { %v427_v10 = vmul.f32 0.5, %v426_v6 }
 0x147   : > { %v428_v14 = vsub.f32 1.5, %v427_v10 }
 0x148   : > { %519 = vperm.xlu0 %1729, %v477_v11  }
 0x149   : > { %v429_v15 = vmul.f32 %v1739_v63, %v428_v14 }
 0x14b   : > { %v433_v17 = vsel %vm432_vm10, %v1739_v63, %v429_v15 }
 0x14c   : > { %441 = vperm.xlu2 %1730, %v413_v16   ;;  %451 = vperm.xlu1 %1731, %v433_v17  }
 0x150   : > { %509 = vperm.xlu0 %1729, %v475_v19  }
 0x154   : > { %504 = vperm.xlu2 %1730, %v474_v21   ;;  %436 = vperm.xlu1 %1731, %v403_v22   ;;  %v1453_v22 = vld [vmem:[%s2345_s4 + $0x8] sm:$0xff] }
 0x158   : > { %514 = vperm.xlu0 %1729, %v476_v23  }
 0x15c   : > { %484 = vperm.xlu1 %1731, %v470_v24   ;;  %v1454_v24 = vld [vmem:[%s2345_s4 + $0x10] sm:$0xff] }
 0x160   : > { %534 = vperm.xlu0 %1729, %v480_v25  }
 0x168   : > { %524 = vperm.xlu0 %1729, %v478_v26  }
 0x17a   : > { %v374_v27 = vpop.permute.xlu2 %373 }
 0x17b   : > { %v387_v37 = vsub.f32 %v1973_v1, %v374_v27  ;;  %v459_v1 = vld [vmem:[%s2342_s1 + $0x8] sm:$0xff]  ;;  %v469_v27 = vld [vmem:[%s2342_s1 + $0x58] sm:$0xff] }
 0x18a   : > { %v384_v28 = vpop.permute.xlu2 %383  ;;  %v369_v29 = vpop.permute.xlu1 %368 }
 0x18b   : > { %v389_v32 = vsub.f32 %v1970_v0, %v384_v28  ;;  %v386_v40 = vsub.f32 %v1988_v8, %v369_v29  ;;  %v458_v0 = vld [vmem:[%s2342_s1] sm:$0xff]  ;;  %v461_v8 = vld [vmem:[%s2342_s1 + $0x18] sm:$0xff] }
 0x18c   : > { %v1455_v28 = vld [vmem:[%s2345_s4 + $0x18] sm:$0xff] }
 0x19a   : > { %v379_v31 = vpop.permute.xlu0 %378 }
 0x19b   : > { %v388_v33 = vsub.f32 %v1976_v2, %v379_v31  ;;  %v460_v2 = vld [vmem:[%s2342_s1 + $0x10] sm:$0xff] }
 0x19e   : > { %v447_v30 = vpop.permute.xlu2 %446 }
 0x19f   : > { %v456_v38 = vmul.f32 %v447_v30, %v388_v33 }
 0x1a2   : > { %v490_v54 = vpop.permute.xlu0 %489 }
 0x1a6   : > { %v442_v36 = vpop.permute.xlu2 %441 }
 0x1a7   : > { %v455_v39 = vmul.f32 %v442_v36, %v387_v37  ;;  %v1452_v36 = vld [vmem:[%s2345_s4] sm:$0xff] }
 0x1aa   : > { %v500_v58 = vpop.permute.xlu0 %499 }
 0x1ae   : > { %v505_v62 = vpop.permute.xlu2 %504 }
 0x1b2   : > { %v2101_v4 = vpop.permute.xlu0 %494 }
 0x1ba   : > { %v520_v7 = vpop.permute.xlu0 %519 }
 0x1be   : > { %v452_v34 = vpop.permute.xlu1 %451 }
 0x1bf   : > { %v457_v35 = vmul.f32 %v452_v34, %v389_v32 }
 0x1c1   : > { %590 = vmatpush.msrb.mxu1 %v457_v35  ;;  %1681 = vmatpush.msra.mxu2 %v457_v35 }
 0x1c2   : > { %v2107_v10 = vpop.permute.xlu0 %509 }
 0x1c3   : > { %591 = vmatpush.msrb.mxu1 %v456_v38  ;;  %1682 = vmatpush.msra.mxu2 %v456_v38  ;;  %v481_v38 = vld [vmem:[%s2343_s2 + $0x58] sm:$0xff] }
 0x1c5   : > { %592 = vmatpush.msrb.mxu1 %v455_v39  ;;  %1683 = vmatpush.msra.mxu2 %v455_v39 }
 0x1c6   : > { %v437_v41 = vpop.permute.xlu1 %436 }
 0x1c7   : > { %v454_v42 = vmul.f32 %v437_v41, %v386_v40 }
 0x1c9   : > { %593 = vmatpush.msrb.mxu1 %v454_v42  ;;  %1684 = vmatpush.msra.mxu2 %v454_v42 }
 0x1ca   : > { %1622 = vmatmul.msk.f32.vlgmr.msrb.gmra.mxu1 %vm287_vm1, %v458_v0  ;;  %1623 = vmatmul.msk.f32.vlgmr.msra.gmra.mxu2 %vm287_vm1, %v459_v1  ;;  %v2111_v12 = vpop.permute.xlu0 %514 }
 0x1ce   : > { %v485_v50 = vpop.permute.xlu1 %484 }
 0x1d2   : > { %1624 = vmatmul.msk.f32.gmra.mxu2 %vm287_vm1, %v460_v2  ;;  %v535_v15 = vpop.permute.xlu0 %534 }
 0x1da   : > { %1625 = vmatmul.msk.f32.gmra.mxu2 %vm287_vm1, %v461_v8 }
 0x1e2   : > { %1626 = vmatmul.msk.f32.gmra.mxu2 %vm287_vm1, %v462_v43 }
 0x1ea   : > { %1627 = vmatmul.msk.f32.gmra.mxu2 %vm287_vm1, %v463_v44 }
 0x1f2   : > { %1628 = vmatmul.msk.f32.gmra.mxu2 %vm287_vm1, %v464_v45 }
 0x1fa   : > { %1629 = vmatmul.msk.f32.gmra.mxu2 %vm287_vm1, %v465_v46 }
 0x202   : > { %1630 = vmatmul.msk.f32.gmra.mxu2 %vm287_vm1, %v466_v47 }
 0x20a   : > { %1631 = vmatmul.msk.f32.gmra.mxu2 %vm287_vm1, %v467_v48 }
 0x212   : > { %1632 = vmatmul.msk.f32.gmra.mxu2 %vm287_vm1, %v468_v49 }
 0x21a   : > { %1633 = vmatmul.msk.f32.gmra.mxu2 %vm287_vm1, %v469_v27 }
 0x247   : > { %v595_v51 = vpop.f32.mrf.mxu1 }
 0x248   : > { %v596_v52 = vadd.f32 %v595_v51, %v485_v50 }
 0x24a   : > { %v631_v53 = vmul.f32 0.35355338, %v596_v52 }
 0x24c   : > { %704 = vmatpush.msra.mxu1 %v631_v53  ;;  %1685 = vmatpush.msra.mxu3 %v631_v53 }
 0x24d   : > { %v598_v55 = vpop.f32.mrf.mxu2 }
 0x24e   : > { %v599_v56 = vadd.f32 %v598_v55, %v490_v54 }
 0x250   : > { %632 = vxpose.xlu2.b32.start.end [1/1] (short) (narrow) %v599_v56, 64 }
 0x255   : > { %v2099_v57 = vpop.f32.mrf.mxu2 }
 0x25d   : > { %v604_v59 = vpop.f32.mrf.mxu2 }
 0x25e   : > { %v605_v60 = vadd.f32 %v604_v59, %v500_v58 }
 0x260   : > { %v835_v61 = vmul.f32 0.35355338, %v605_v60 }
 0x262   : > { %907 = vmatpush.msrb.mxu1 %v835_v61 }
 0x265   : > { %v607_v63 = vpop.f32.mrf.mxu2 }
 0x266   : > { %v608_v3 = vadd.f32 %v607_v63, %v505_v62 }
 0x268   : > { %836 = vxpose.xlu1.b32.start.end [1/1] (short) (narrow) %v608_v3, 64 }
 0x26d   : > { %v2103_v5 = vpop.f32.mrf.mxu2 }
 0x275   : > { %v2105_v6 = vpop.f32.mrf.mxu2 }
 0x27d   : > { %v616_v9 = vpop.f32.mrf.mxu2 }
 0x27e   : > { %v617_v14 = vadd.f32 %v616_v9, %v520_v7 }
 0x285   : > { %v2109_v11 = vpop.f32.mrf.mxu2 }
 0x28d   : > { %v2113_v13 = vpop.f32.mrf.mxu2 }
 0x290   : > { %1039 = vxpose.xlu2.b32.start.end [1/1] (short) (narrow) %v617_v14, 64 }
 0x295   : > { %v625_v16 = vpop.f32.mrf.mxu2 }
 0x296   : > { %v626_v17 = vadd.f32 %v625_v16, %v535_v15 }
 0x298   : > { %1242 = vxpose.xlu0.b32.start.end [1/1] (short) (narrow) %v626_v17, 64 }
 0x2e9   : > { %v648_v18 = vpop.trf.xlu2 }
 0x2ea   : > { %1634 = vmatmul.msk.f32.vlgmr.msra.gmra.mxu1 %vm664_vm14, %v648_v18 }
 0x2f1   : > { %v649_v19 = vpop.trf.xlu2 }
 0x2f2   : > { %1635 = vmatmul.msk.f32.vlgmr.msra.gmra.mxu3 %vm664_vm14, %v649_v19 }
 0x2f9   : > { %v650_v21 = vpop.trf.xlu2 }
 0x2fa   : > { %529 = vperm.xlu1 %1731, %v479_v20   ;;  %1636 = vmatmul.msk.f32.gmra.mxu3 %vm664_vm14, %v650_v21 }
 0x301   : > { %v651_v23 = vpop.trf.xlu2 }
 0x302   : > { %1463 = vperm.xlu1 %1731, %v1453_v22   ;;  %1637 = vmatmul.msk.f32.gmra.mxu3 %vm664_vm14, %v651_v23 }
 0x309   : > { %v652_v25 = vpop.trf.xlu2 }
 0x30a   : > { %1468 = vperm.xlu1 %1731, %v1454_v24   ;;  %1638 = vmatmul.msk.f32.gmra.mxu3 %vm664_vm14, %v652_v25 }
 0x30c   : > { %v852_v26 = vpop.trf.xlu1 }
 0x30d   : > { %1643 = vmatmul.msk.f32.vlgmr.msrb.gmra.mxu1 %vm664_vm14, %v852_v26 }
 0x311   : > { %v653_v29 = vpop.trf.xlu2 }
 0x312   : > { %1473 = vperm.xlu1 %1731, %v1455_v28   ;;  %1639 = vmatmul.msk.f32.gmra.mxu3 %vm664_vm14, %v653_v29 }
 0x314   : > { %v853_v30 = vpop.trf.xlu1 }
 0x315   : > { %1644 = vmatmul.msk.f32.gmra.mxu1 %vm664_vm14, %v853_v30 }
 0x319   : > { %v654_v31 = vpop.trf.xlu2 }
 0x31a   : > { %1640 = vmatmul.msk.f32.gmra.mxu3 %vm664_vm14, %v654_v31 }
 0x31c   : > { %v854_v32 = vpop.trf.xlu1 }
 0x31d   : > { %1645 = vmatmul.msk.f32.gmra.mxu1 %vm664_vm14, %v854_v32 }
 0x321   : > { %v655_v33 = vpop.trf.xlu2 }
 0x322   : > { %1641 = vmatmul.msk.f32.gmra.mxu3 %vm664_vm14, %v655_v33 }
 0x324   : > { %v855_v34 = vpop.trf.xlu1 }
 0x325   : > { %1646 = vmatmul.msk.f32.gmra.mxu1 %vm664_vm14, %v855_v34 }
 0x32c   : > { %v856_v35 = vpop.trf.xlu1 }
 0x32d   : > { %1647 = vmatmul.msk.f32.gmra.mxu1 %vm664_vm14, %v856_v35 }
 0x331   : > { %1458 = vperm.xlu2 %1730, %v1452_v36  }
 0x334   : > { %v857_v37 = vpop.trf.xlu1 }
 0x335   : > { %1648 = vmatmul.msk.f32.gmra.mxu1 %vm664_vm14, %v857_v37 }
 0x33c   : > { %v858_v39 = vpop.trf.xlu1 }
 0x33d   : > { %1649 = vmatmul.msk.f32.gmra.mxu1 %vm664_vm14, %v858_v39 }
 0x33e   : > { %539 = vperm.xlu0 %1729, %v481_v38  }
 0x344   : > { %v859_v40 = vpop.trf.xlu1 }
 0x345   : > { %1650 = vmatmul.msk.f32.gmra.mxu1 %vm664_vm14, %v859_v40 }
 0x367   : > { %v706_v0 = vpop.f32.mrf.mxu1 }
 0x368   : > { %v730_v54 = vsel %vm254_vm0, %v706_v0, -inf }
 0x375   : > { %v709_v41 = vpop.f32.mrf.mxu3 }
 0x376   : > { %v731_v49 = vsel %vm254_vm0, %v709_v41, -inf }
 0x37d   : > { %v712_v42 = vpop.f32.mrf.mxu3 }
 0x37e   : > { %v732_v55 = vsel %vm254_vm0, %v712_v42, -inf }
 0x385   : > { %v715_v1 = vpop.f32.mrf.mxu3 }
 0x386   : > { %v733_v56 = vsel %vm254_vm0, %v715_v1, -inf }
 0x38a   : > { %v2153_v2 = vpop.f32.mrf.mxu1 }
 0x38d   : > { %v718_v8 = vpop.f32.mrf.mxu3 }
 0x38e   : > { %v734_v50 = vsel %vm254_vm0, %v718_v8, -inf }
 0x38f   : > { %v735_v59 = vmax.f32 %v730_v54, %v734_v50 }
 0x392   : > { %v2155_v43 = vpop.f32.mrf.mxu1 }
 0x393   : > { %v934_v36 = vsel %vm254_vm0, %v2155_v43, -inf }
 0x395   : > { %v721_v44 = vpop.f32.mrf.mxu3 }
 0x396   : > { %v736_v47 = vsel %vm254_vm0, %v721_v44, -inf }
 0x397   : > { %v737_v52 = vmax.f32 %v731_v49, %v736_v47 }
 0x399   : > { %v742_v62 = vmax.f32 %v735_v59, %v737_v52 }
 0x39a   : > { %v2157_v45 = vpop.f32.mrf.mxu1 }
 0x39d   : > { %v724_v46 = vpop.f32.mrf.mxu3 }
 0x39e   : > { %v738_v51 = vsel %vm254_vm0, %v724_v46, -inf }
 0x39f   : > { %v739_v60 = vmax.f32 %v732_v55, %v738_v51 }
 0x3a2   : > { %v2160_v48 = vpop.f32.mrf.mxu1 }
 0x3a5   : > { %v727_v53 = vpop.f32.mrf.mxu3 }
 0x3a6   : > { %v740_v58 = vsel %vm254_vm0, %v727_v53, -inf }
 0x3a7   : > { %v741_v61 = vmax.f32 %v733_v56, %v740_v58 }
 0x3a9   : > { %v743_v63 = vmax.f32 %v739_v60, %v741_v61 }
 0x3aa   : > { %v2169_v3 = vpop.f32.mrf.mxu1 }
 0x3ab   : > { %v744_v7 = vmax.f32 %v742_v62, %v743_v63  ;;  %v937_v38 = vsel %vm254_vm0, %v2169_v3, -inf }
 0x3ad   : > { %v745_v9 = vrot.slane %v744_v7, 4 }
 0x3af   : > { %v746_v14 = vmax.f32 %v744_v7, %v745_v9 }
 0x3b1   : > { %v747_v15 = vrot.slane %v746_v14, 2 }
 0x3b2   : > { %v2171_v16 = vpop.f32.mrf.mxu1 }
 0x3b3   : > { %v748_v17 = vmax.f32 %v746_v14, %v747_v15  ;;  %v939_v34 = vsel %vm254_vm0, %v2171_v16, -inf }
 0x3b5   : > { %v749_v18 = vrot.slane %v748_v17, 1 }
 0x3b7   : > { %v750_v19 = vmax.f32 %v748_v17, %v749_v18 }
 0x3b9   : > { %v758_v20 = vsub.f32 %v727_v53, %v750_v19  ;;  %v757_v21 = vsub.f32 %v724_v46, %v750_v19  ;;  %v756_v22 = vsub.f32 %v721_v44, %v750_v19  ;;  %v755_v23 = vsub.f32 %v718_v8, %v750_v19 }
 0x3ba   : > { %v2173_v24 = vpop.f32.mrf.mxu1  ;;  %v753_v25 = vsub.f32 %v712_v42, %v750_v19  ;;  %v752_v28 = vsub.f32 %v709_v41, %v750_v19  ;;  %v751_v30 = vsub.f32 %v706_v0, %v750_v19  ;;  %v754_v32 = vsub.f32 %v715_v1, %v750_v19 }
 0x3bb   : > { %v773_v26 = vmul.f32 1.442695, %v758_v20  ;;  %v771_v27 = vmul.f32 1.442695, %v757_v21  ;;  %v769_v29 = vmul.f32 1.442695, %v756_v22  ;;  %v940_v42 = vmax.f32 %v934_v36, %v939_v34 }
 0x3bc   : > { %v767_v31 = vmul.f32 1.442695, %v755_v23  ;;  %v763_v33 = vmul.f32 1.442695, %v753_v25  ;;  %v761_v35 = vmul.f32 1.442695, %v752_v28  ;;  %v602_v22 = vadd.f32 %v2099_v57, %v2101_v4 }
 0x3bd   : > { %1740 = vpow2.f32 %v773_v26  ;;  %v759_v37 = vmul.f32 1.442695, %v751_v30  ;;  %v941_v39 = vsel %vm254_vm0, %v2173_v24, -inf  ;;  %v765_v40 = vmul.f32 1.442695, %v754_v32 }
 0x3be   : > { %1742 = vpow2.f32 %v771_v27  ;;  %v933_v41 = vsel %vm254_vm0, %v2153_v2, -inf  ;;  %v935_v8 = vsel %vm254_vm0, %v2157_v45, -inf  ;;  %v936_v44 = vsel %vm254_vm0, %v2160_v48, -inf }
 0x3bf   : > { %1744 = vpow2.f32 %v769_v29  ;;  %v938_v47 = vmax.f32 %v933_v41, %v937_v38  ;;  %v942_v49 = vmax.f32 %v935_v8, %v941_v39 }
 0x3c0   : > { %1746 = vpow2.f32 %v767_v31 }
 0x3c1   : > { %1748 = vpow2.f32 %v763_v33  ;;  %v945_v53 = vmax.f32 %v938_v47, %v940_v42 }
 0x3c2   : > { %v2185_v0 = vpop.f32.mrf.mxu1  ;;  %1750 = vpow2.f32 %v761_v35 }
 0x3c3   : > { %v1741_v1 = vpop.eup %1740  ;;  %v943_v46 = vsel %vm254_vm0, %v2185_v0, -inf  ;;  %1752 = vpow2.f32 %v759_v37 }
 0x3c4   : > { %v944_v50 = vmax.f32 %v936_v44, %v943_v46  ;;  %807 = vmatpush.msrb.mxu0 %v1741_v1  ;;  %v1743_v51 = vpop.eup %1742  ;;  %1754 = vpow2.f32 %v765_v40  ;;  %v788_v39 = vsel %vm254_vm0, %v1741_v1, 0.0 }
 0x3c5   : > { %v1745_v52 = vpop.eup %1744  ;;  %v786_v34 = vsel %vm254_vm0, %v1743_v51, 0.0 }
 0x3c6   : > { %v946_v54 = vmax.f32 %v942_v49, %v944_v50  ;;  %808 = vmatpush.msrb.mxu0 %v1743_v51  ;;  %v1747_v55 = vpop.eup %1746  ;;  %v784_v27 = vsel %vm254_vm0, %v1745_v52, 0.0 }
 0x3c7   : > { %v1749_v56 = vpop.eup %1748  ;;  %v782_v23 = vsel %vm254_vm0, %v1747_v55, 0.0 }
 0x3c8   : > { %v947_v58 = vmax.f32 %v945_v53, %v946_v54  ;;  %809 = vmatpush.msrb.mxu0 %v1745_v52  ;;  %v1751_v59 = vpop.eup %1750  ;;  %v778_v15 = vsel %vm254_vm0, %v1749_v56, 0.0 }
 0x3c9   : > { %v1753_v60 = vpop.eup %1752  ;;  %v776_v62 = vsel %vm254_vm0, %v1751_v59, 0.0 }
 0x3ca   : > { %v948_v61 = vrot.slane %v947_v58, 4  ;;  %810 = vmatpush.msrb.mxu0 %v1747_v55  ;;  %v1755_v63 = vpop.eup %1754  ;;  %v775_v7 = vsel %vm254_vm0, %v1753_v60, 0.0 }
 0x3cb   : > { %v777_v14 = vadd.f32 %v776_v62, %v775_v7  ;;  %v780_v19 = vsel %vm254_vm0, %v1755_v63, 0.0 }
 0x3cc   : > { %v949_v9 = vmax.f32 %v947_v58, %v948_v61  ;;  %811 = vmatpush.msrb.mxu0 %v1755_v63 }
 0x3cd   : > { %v779_v18 = vadd.f32 %v778_v15, %v777_v14  ;;  %v614_v14 = vadd.f32 %v2105_v6, %v2111_v12  ;;  %v611_v15 = vadd.f32 %v2103_v5, %v2107_v10 }
 0x3ce   : > { %v950_v17 = vrot.slane %v949_v9, 2  ;;  %812 = vmatpush.msrb.mxu0 %v1749_v56 }
 0x3cf   : > { %v781_v21 = vadd.f32 %v780_v19, %v779_v18 }
 0x3d0   : > { %v951_v20 = vmax.f32 %v949_v9, %v950_v17  ;;  %813 = vmatpush.msrb.mxu0 %v1751_v59  ;;  %v1055_v9 = vpop.trf.xlu2  ;;  %v1038_v17 = vmul.f32 0.35355338, %v614_v14 }
 0x3d1   : > { %v783_v26 = vadd.f32 %v782_v23, %v781_v21 }
 0x3d2   : > { %v952_v25 = vrot.slane %v951_v20, 1  ;;  %814 = vmatpush.msrb.mxu0 %v1753_v60 }
 0x3d3   : > { %1642 = vmatmul.msk.f32.vlgmr.msrb.gmra.mxu0 %vm254_vm0, %v602_v22  ;;  %v785_v29 = vadd.f32 %v784_v27, %v783_v26 }
 0x3d4   : > { %v953_v28 = vmax.f32 %v951_v20, %v952_v25 }
 0x3d5   : > { %v787_v38 = vadd.f32 %v786_v34, %v785_v29 }
 0x3d6   : > { %v954_v30 = vsub.f32 %v2153_v2, %v953_v28  ;;  %v955_v31 = vsub.f32 %v2155_v43, %v953_v28  ;;  %v956_v32 = vsub.f32 %v2157_v45, %v953_v28  ;;  %v957_v33 = vsub.f32 %v2160_v48, %v953_v28 }
 0x3d7   : > { %v958_v57 = vsub.f32 %v2169_v3, %v953_v28  ;;  %v959_v4 = vsub.f32 %v2171_v16, %v953_v28  ;;  %v961_v2 = vsub.f32 %v2185_v0, %v953_v28  ;;  %v789_v43 = vadd.f32 %v788_v39, %v787_v38 }
 0x3d8   : > { %v962_v35 = vmul.f32 1.442695, %v954_v30  ;;  %v964_v36 = vmul.f32 1.442695, %v955_v31  ;;  %v966_v37 = vmul.f32 1.442695, %v956_v32  ;;  %v960_v45 = vsub.f32 %v2173_v24, %v953_v28  ;;  %v1056_v18 = vpop.trf.xlu2 }
 0x3d9   : > { %v968_v40 = vmul.f32 1.442695, %v957_v33  ;;  %v970_v48 = vmul.f32 1.442695, %v958_v57  ;;  %v972_v3 = vmul.f32 1.442695, %v959_v4 }
 0x3da   : > { %1756 = vpow2.f32 %v962_v35  ;;  %v976_v16 = vmul.f32 1.442695, %v961_v2  ;;  %v974_v41 = vmul.f32 1.442695, %v960_v45  ;;  %v790_v12 = vrot.slane %v789_v43, 4 }
 0x3db   : > { %1758 = vpow2.f32 %v964_v36 }
 0x3dc   : > { %1760 = vpow2.f32 %v966_v37  ;;  %v791_v5 = vadd.f32 %v790_v12, %v789_v43 }
 0x3dd   : > { %1762 = vpow2.f32 %v968_v40 }
 0x3de   : > { %1764 = vpow2.f32 %v970_v48  ;;  %v792_v21 = vrot.slane %v791_v5, 2 }
 0x3df   : > { %1766 = vpow2.f32 %v972_v3 }
 0x3e0   : > { %v1757_v42 = vpop.eup %1756  ;;  %1768 = vpow2.f32 %v976_v16  ;;  %v1057_v19 = vpop.trf.xlu2  ;;  %v793_v22 = vadd.f32 %v792_v21, %v791_v5 }
 0x3e1   : > { %v1759_v8 = vpop.eup %1758  ;;  %v978_v1 = vsel %vm254_vm0, %v1757_v42, 0.0  ;;  %1770 = vpow2.f32 %v974_v41 }
 0x3e2   : > { %v1761_v0 = vpop.eup %1760  ;;  %v979_v44 = vsel %vm254_vm0, %v1759_v8, 0.0  ;;  %v794_v25 = vrot.slane %v793_v22, 1 }
 0x3e3   : > { %v1763_v46 = vpop.eup %1762  ;;  %v980_v24 = vadd.f32 %v979_v44, %v978_v1  ;;  %v981_v47 = vsel %vm254_vm0, %v1761_v0, 0.0 }
 0x3e4   : > { %v1765_v49 = vpop.eup %1764  ;;  %v983_v52 = vsel %vm254_vm0, %v1763_v46, 0.0  ;;  %v795_v26 = vadd.f32 %v794_v25, %v793_v22 }
 0x3e5   : > { %v982_v50 = vadd.f32 %v981_v47, %v980_v24  ;;  %v1767_v51 = vpop.eup %1766  ;;  %v985_v55 = vsel %vm254_vm0, %v1765_v49, 0.0 }
 0x3e6   : > { %v1769_v53 = vpop.eup %1768  ;;  %v987_v59 = vsel %vm254_vm0, %v1767_v51, 0.0  ;;  %1772 = vrcp.f32 %v795_v26  ;;  %v830_v34 = vand.u32 2147483648, %v795_v26  ;;  %vm824_vm2 = vweird.f32 %v795_v26 }
 0x3e7   : > { %v984_v54 = vadd.f32 %v983_v52, %v982_v50  ;;  %1010 = vmatpush.msra.mxu0 %v1769_v53  ;;  %v1771_v56 = vpop.eup %1770  ;;  %v991_v63 = vsel %vm254_vm0, %v1769_v53, 0.0  ;;  %v828_v35 = vand.u32 2147483647, %v795_v26 }
 0x3e8   : > { %v989_v61 = vsel %vm254_vm0, %v1771_v56, 0.0  ;;  %v1058_v20 = vpop.trf.xlu2  ;;  %v831_v38 = vor.u32 1.1754944e-38, %v830_v34 }
 0x3e9   : > { %v986_v58 = vadd.f32 %v985_v55, %v984_v54  ;;  %1011 = vmatpush.msra.mxu0 %v1771_v56  ;;  %vm829_vm4 = vcmp.eq.f32.partialorder %v828_v35, 8.507059e+37 }
 0x3eb   : > { %v988_v60 = vadd.f32 %v987_v59, %v986_v58  ;;  %1012 = vmatpush.msra.mxu0 %v1767_v51 }
 0x3ec   : > { %v1773_v28 = vpop.eup %1772 }
 0x3ed   : > { %v990_v62 = vadd.f32 %v989_v61, %v988_v60  ;;  %1013 = vmatpush.msra.mxu0 %v1765_v49  ;;  %v820_v29 = vmul.f32 %v1773_v28, %v795_v26  ;;  %vm825_vm15 = vweird.f32 %v1773_v28 }
 0x3ee   : > { %vm826_vm3 = vmor %vm824_vm2, %vm825_vm15 }
 0x3ef   : > { %v992_v7 = vadd.f32 %v991_v63, %v990_v62  ;;  %1014 = vmatpush.msra.mxu0 %v1763_v46  ;;  %v821_v31 = vsub.f32 1.0, %v820_v29 }
 0x3f0   : > { %v1059_v6 = vpop.trf.xlu2 }
 0x3f1   : > { %1015 = vmatpush.msra.mxu0 %v1761_v0  ;;  %v993_v30 = vrot.slane %v992_v7, 4  ;;  %v822_v33 = vmul.f32 %v1773_v28, %v821_v31 }
 0x3f3   : > { %1016 = vmatpush.msra.mxu0 %v1759_v8  ;;  %v994_v32 = vadd.f32 %v993_v30, %v992_v7  ;;  %v823_v4 = vadd.f32 %v1773_v28, %v822_v33 }
 0x3f5   : > { %1017 = vmatpush.msra.mxu0 %v1757_v42  ;;  %v995_v57 = vrot.slane %v994_v32, 2  ;;  %v827_v37 = vsel %vm826_vm3, %v1773_v28, %v823_v4 }
 0x3f6   : > { %1651 = vmatmul.msk.f32.vlgmr.msra.gmra.mxu0 %vm254_vm0, %v611_v15  ;;  %v832_v40 = vsel %vm829_vm4, %v831_v38, %v827_v37 }
 0x3f7   : > { %1110 = vmatpush.msrb.mxu0 %v1038_v17  ;;  %v996_v36 = vadd.f32 %v995_v57, %v994_v32 }
 0x3f8   : > { %v1060_v10 = vpop.trf.xlu2 }
 0x3f9   : > { %v997_v39 = vrot.slane %v996_v36, 1 }
 0x3fb   : > { %v998_v45 = vadd.f32 %v997_v39, %v996_v36 }
 0x3fd   : > { %1774 = vrcp.f32 %v998_v45  ;;  %v1033_v8 = vand.u32 2147483648, %v998_v45  ;;  %vm1027_vm6 = vweird.f32 %v998_v45  ;;  %v1031_v1 = vand.u32 2147483647, %v998_v45 }
 0x3fe   : > { %1652 = vmatmul.msk.f32.vlgmr.msrb.gmra.mxu0 %vm664_vm14, %v1055_v9 }
 0x3ff   : > { %v1034_v44 = vor.u32 1.1754944e-38, %v1033_v8  ;;  %vm1032_vm8 = vcmp.eq.f32.partialorder %v1031_v1, 8.507059e+37  ;;  %v530_v8 = vpop.permute.xlu1 %529 }
 0x400   : > { %v1061_v23 = vpop.trf.xlu2 }
 0x403   : > { %v1775_v48 = vpop.eup %1774 }
 0x404   : > { %v1023_v3 = vmul.f32 %v1775_v48, %v998_v45  ;;  %vm1028_vm5 = vweird.f32 %v1775_v48 }
 0x405   : > { %vm1029_vm7 = vmor %vm1027_vm6, %vm1028_vm5 }
 0x406   : > { %1653 = vmatmul.msk.f32.gmra.mxu0 %vm664_vm14, %v1056_v18  ;;  %v1024_v16 = vsub.f32 1.0, %v1023_v3 }
 0x408   : > { %v1062_v27 = vpop.trf.xlu2  ;;  %v1025_v41 = vmul.f32 %v1775_v48, %v1024_v16 }
 0x40a   : > { %v1026_v42 = vadd.f32 %v1775_v48, %v1025_v41 }
 0x40c   : > { %v1030_v0 = vsel %vm1029_vm7, %v1775_v48, %v1026_v42 }
 0x40d   : > { %v1035_v24 = vsel %vm1032_vm8, %v1034_v44, %v1030_v0 }
 0x40e   : > { %1654 = vmatmul.msk.f32.gmra.mxu0 %vm664_vm14, %v1057_v19 }
 0x416   : > { %1655 = vmatmul.msk.f32.gmra.mxu0 %vm664_vm14, %v1058_v20 }
 0x41e   : > { %1656 = vmatmul.msk.f32.gmra.mxu0 %vm664_vm14, %v1059_v6 }
 0x426   : > { %1657 = vmatmul.msk.f32.gmra.mxu0 %vm664_vm14, %v1060_v10 }
 0x42e   : > { %1658 = vmatmul.msk.f32.gmra.mxu0 %vm664_vm14, %v1061_v23 }
 0x436   : > { %1659 = vmatmul.msk.f32.gmra.mxu0 %vm664_vm14, %v1062_v27 }
 0x450   : > { %v816_v2 = vpop.f32.mrf.mxu0 }
 0x451   : > { %v833_v43 = vmul.f32 %v832_v40, %v816_v2  ;;  %v525_v2 = vpop.permute.xlu0 %524 }
 0x453   : > { %834 = vst.msk [vmem:[#allocation2] sm:$0xff] %vm254_vm0, %v833_v43 }
 0x459   : > { %v1258_v0 = vpop.trf.xlu0 }
 0x473   : > { %v1019_v46 = vpop.f32.mrf.mxu0 }
 0x474   : > { %v1036_v47 = vmul.f32 %v1035_v24, %v1019_v46  ;;  %v623_v24 = vadd.f32 %v2113_v13, %v530_v8 }
 0x476   : > { %1037 = vst.msk [vmem:[#allocation2 + $0x8] sm:$0xff] %vm254_vm0, %v1036_v47 }
 0x47b   : > { %v1112_v49 = vpop.f32.mrf.mxu0 }
 0x47c   : > { %v1136_v63 = vsel %vm254_vm0, %v1112_v49, -inf }
 0x483   : > { %v1115_v50 = vpop.f32.mrf.mxu0 }
 0x484   : > { %v1137_v58 = vsel %vm254_vm0, %v1115_v50, -inf }
 0x48b   : > { %v1118_v51 = vpop.f32.mrf.mxu0 }
 0x48c   : > { %v1138_v7 = vsel %vm254_vm0, %v1118_v51, -inf }
 0x493   : > { %v1121_v52 = vpop.f32.mrf.mxu0 }
 0x494   : > { %v1139_v9 = vsel %vm254_vm0, %v1121_v52, -inf }
 0x49b   : > { %v1124_v53 = vpop.f32.mrf.mxu0 }
 0x49c   : > { %v1140_v59 = vsel %vm254_vm0, %v1124_v53, -inf }
 0x49d   : > { %v1141_v15 = vmax.f32 %v1136_v63, %v1140_v59 }
 0x4a3   : > { %v1127_v54 = vpop.f32.mrf.mxu0 }
 0x4a4   : > { %v1142_v56 = vsel %vm254_vm0, %v1127_v54, -inf }
 0x4a5   : > { %v1143_v61 = vmax.f32 %v1137_v58, %v1142_v56  ;;  %v1259_v58 = vpop.trf.xlu0 }
 0x4a7   : > { %v1148_v19 = vmax.f32 %v1141_v15, %v1143_v61 }
 0x4ab   : > { %v1130_v55 = vpop.f32.mrf.mxu0 }
 0x4ac   : > { %v1144_v60 = vsel %vm254_vm0, %v1130_v55, -inf }
 0x4ad   : > { %v1145_v17 = vmax.f32 %v1138_v7, %v1144_v60 }
 0x4b3   : > { %v1133_v62 = vpop.f32.mrf.mxu0 }
 0x4b4   : > { %v1146_v14 = vsel %vm254_vm0, %v1133_v62, -inf }
 0x4b5   : > { %v1147_v18 = vmax.f32 %v1139_v9, %v1146_v14 }
 0x4b7   : > { %v1149_v20 = vmax.f32 %v1145_v17, %v1147_v18 }
 0x4b9   : > { %v1150_v6 = vmax.f32 %v1148_v19, %v1149_v20 }
 0x4bb   : > { %v1151_v12 = vrot.slane %v1150_v6, 4 }
 0x4bd   : > { %v1152_v5 = vmax.f32 %v1150_v6, %v1151_v12 }
 0x4bf   : > { %v1153_v10 = vrot.slane %v1152_v5, 2 }
 0x4c1   : > { %v1154_v21 = vmax.f32 %v1152_v5, %v1153_v10 }
 0x4c3   : > { %v1155_v22 = vrot.slane %v1154_v21, 1 }
 0x4c5   : > { %v1156_v23 = vmax.f32 %v1154_v21, %v1155_v22 }
 0x4c7   : > { %v1164_v25 = vsub.f32 %v1133_v62, %v1156_v23  ;;  %v1163_v26 = vsub.f32 %v1130_v55, %v1156_v23  ;;  %v1162_v27 = vsub.f32 %v1127_v54, %v1156_v23  ;;  %v1161_v28 = vsub.f32 %v1124_v53, %v1156_v23 }
 0x4c8   : > { %v1159_v29 = vsub.f32 %v1118_v51, %v1156_v23  ;;  %v1158_v32 = vsub.f32 %v1115_v50, %v1156_v23  ;;  %v1157_v57 = vsub.f32 %v1112_v49, %v1156_v23  ;;  %v1160_v34 = vsub.f32 %v1121_v52, %v1156_v23 }
 0x4c9   : > { %v1179_v30 = vmul.f32 1.442695, %v1164_v25  ;;  %v1177_v31 = vmul.f32 1.442695, %v1163_v26  ;;  %v1175_v33 = vmul.f32 1.442695, %v1162_v27  ;;  %v620_v51 = vadd.f32 %v2109_v11, %v525_v2  ;;  %v1260_v11 = vpop.trf.xlu0 }
 0x4ca   : > { %v1173_v4 = vmul.f32 1.442695, %v1161_v28  ;;  %v1169_v35 = vmul.f32 1.442695, %v1159_v29  ;;  %v1167_v36 = vmul.f32 1.442695, %v1158_v32 }
 0x4cb   : > { %1776 = vpow2.f32 %v1179_v30  ;;  %v1165_v37 = vmul.f32 1.442695, %v1157_v57  ;;  %v1171_v38 = vmul.f32 1.442695, %v1160_v34  ;;  %v1241_v53 = vmul.f32 0.35355338, %v623_v24 }
 0x4cc   : > { %1778 = vpow2.f32 %v1177_v31 }
 0x4cd   : > { %1780 = vpow2.f32 %v1175_v33 }
 0x4ce   : > { %1782 = vpow2.f32 %v1173_v4 }
 0x4cf   : > { %1784 = vpow2.f32 %v1169_v35 }
 0x4d0   : > { %1786 = vpow2.f32 %v1167_v36 }
 0x4d1   : > { %v1777_v39 = vpop.eup %1776  ;;  %1788 = vpow2.f32 %v1165_v37  ;;  %v1261_v62 = vpop.trf.xlu0 }
 0x4d2   : > { %1213 = vmatpush.msrb.mxu3 %v1777_v39  ;;  %v1779_v40 = vpop.eup %1778  ;;  %1790 = vpow2.f32 %v1171_v38  ;;  %v1194_v60 = vsel %vm254_vm0, %v1777_v39, 0.0 }
 0x4d3   : > { %v1781_v43 = vpop.eup %1780  ;;  %v1192_v13 = vsel %vm254_vm0, %v1779_v40, 0.0 }
 0x4d4   : > { %1214 = vmatpush.msrb.mxu3 %v1779_v40  ;;  %v1783_v45 = vpop.eup %1782  ;;  %v1190_v55 = vsel %vm254_vm0, %v1781_v43, 0.0 }
 0x4d5   : > { %v1785_v48 = vpop.eup %1784  ;;  %v1188_v52 = vsel %vm254_vm0, %v1783_v45, 0.0 }
 0x4d6   : > { %1215 = vmatpush.msrb.mxu3 %v1781_v43  ;;  %v1787_v3 = vpop.eup %1786  ;;  %v1184_v46 = vsel %vm254_vm0, %v1785_v48, 0.0 }
 0x4d7   : > { %v1789_v16 = vpop.eup %1788  ;;  %v1182_v41 = vsel %vm254_vm0, %v1787_v3, 0.0 }
 0x4d8   : > { %1216 = vmatpush.msrb.mxu3 %v1783_v45  ;;  %v1791_v42 = vpop.eup %1790  ;;  %v1181_v1 = vsel %vm254_vm0, %v1789_v16, 0.0 }
 0x4d9   : > { %v1183_v44 = vadd.f32 %v1182_v41, %v1181_v1  ;;  %v1186_v49 = vsel %vm254_vm0, %v1791_v42, 0.0  ;;  %v1262_v63 = vpop.trf.xlu0 }
 0x4da   : > { %1217 = vmatpush.msrb.mxu3 %v1791_v42 }
 0x4db   : > { %v1185_v47 = vadd.f32 %v1184_v46, %v1183_v44 }
 0x4dc   : > { %1218 = vmatpush.msrb.mxu3 %v1785_v48 }
 0x4dd   : > { %v1187_v50 = vadd.f32 %v1186_v49, %v1185_v47 }
 0x4de   : > { %1219 = vmatpush.msrb.mxu3 %v1787_v3 }
 0x4df   : > { %v1189_v54 = vadd.f32 %v1188_v52, %v1187_v50 }
 0x4e0   : > { %1220 = vmatpush.msrb.mxu3 %v1789_v16 }
 0x4e1   : > { %1660 = vmatmul.msk.f32.vlgmr.msrb.gmra.mxu3 %vm254_vm0, %v620_v51  ;;  %v1191_v56 = vadd.f32 %v1190_v55, %v1189_v54  ;;  %v1263_v7 = vpop.trf.xlu0 }
 0x4e2   : > { %1313 = vmatpush.msra.mxu3 %v1241_v53 }
 0x4e3   : > { %v1193_v59 = vadd.f32 %v1192_v13, %v1191_v56 }
 0x4e5   : > { %v1195_v61 = vadd.f32 %v1194_v60, %v1193_v59 }
 0x4e7   : > { %v1196_v15 = vrot.slane %v1195_v61, 4 }
 0x4e9   : > { %1661 = vmatmul.msk.f32.vlgmr.msra.gmra.mxu3 %vm664_vm14, %v1258_v0  ;;  %v1264_v9 = vpop.trf.xlu0  ;;  %v1197_v17 = vadd.f32 %v1196_v15, %v1195_v61 }
 0x4eb   : > { %v1198_v18 = vrot.slane %v1197_v17, 2 }
 0x4ed   : > { %v1199_v19 = vadd.f32 %v1198_v18, %v1197_v17 }
 0x4ef   : > { %v1200_v20 = vrot.slane %v1199_v19, 1 }
 0x4f1   : > { %1662 = vmatmul.msk.f32.gmra.mxu3 %vm664_vm14, %v1259_v58  ;;  %v1265_v14 = vpop.trf.xlu0  ;;  %v1201_v6 = vadd.f32 %v1200_v20, %v1199_v19 }
 0x4f3   : > { %1792 = vrcp.f32 %v1201_v6  ;;  %v1236_v23 = vand.u32 2147483648, %v1201_v6  ;;  %vm1230_vm10 = vweird.f32 %v1201_v6  ;;  %v1234_v25 = vand.u32 2147483647, %v1201_v6 }
 0x4f5   : > { %v1237_v27 = vor.u32 1.1754944e-38, %v1236_v23  ;;  %vm1235_vm12 = vcmp.eq.f32.partialorder %v1234_v25, 8.507059e+37 }
 0x4f9   : > { %1663 = vmatmul.msk.f32.gmra.mxu3 %vm664_vm14, %v1260_v11  ;;  %v1793_v12 = vpop.eup %1792 }
 0x4fa   : > { %v1226_v5 = vmul.f32 %v1793_v12, %v1201_v6  ;;  %vm1231_vm9 = vweird.f32 %v1793_v12 }
 0x4fb   : > { %vm1232_vm11 = vmor %vm1230_vm10, %vm1231_vm9 }
 0x4fc   : > { %v1227_v10 = vsub.f32 1.0, %v1226_v5 }
 0x4fe   : > { %v1228_v21 = vmul.f32 %v1793_v12, %v1227_v10 }
 0x500   : > { %v1229_v22 = vadd.f32 %v1793_v12, %v1228_v21 }
 0x501   : > { %1664 = vmatmul.msk.f32.gmra.mxu3 %vm664_vm14, %v1261_v62 }
 0x502   : > { %v1233_v26 = vsel %vm1232_vm11, %v1793_v12, %v1229_v22 }
 0x503   : > { %v1238_v29 = vsel %vm1235_vm12, %v1237_v27, %v1233_v26 }
 0x509   : > { %1665 = vmatmul.msk.f32.gmra.mxu3 %vm664_vm14, %v1262_v63 }
 0x511   : > { %1666 = vmatmul.msk.f32.gmra.mxu3 %vm664_vm14, %v1263_v7 }
 0x519   : > { %1667 = vmatmul.msk.f32.gmra.mxu3 %vm664_vm14, %v1264_v9 }
 0x521   : > { %1668 = vmatmul.msk.f32.gmra.mxu3 %vm664_vm14, %v1265_v14 }
 0x564   : > { %v1222_v28 = vpop.f32.mrf.mxu3 }
 0x565   : > { %v1239_v30 = vmul.f32 %v1238_v29, %v1222_v28 }
 0x567   : > { %1240 = vst.msk [vmem:[#allocation2 + $0x10] sm:$0xff] %vm254_vm0, %v1239_v30 }
 0x56c   : > { %v1315_v31 = vpop.f32.mrf.mxu3 }
 0x56d   : > { %v1339_v43 = vsel %vm254_vm0, %v1315_v31, -inf }
 0x574   : > { %v1318_v32 = vpop.f32.mrf.mxu3 }
 0x575   : > { %v1340_v37 = vsel %vm254_vm0, %v1318_v32, -inf }
 0x57c   : > { %v1321_v33 = vpop.f32.mrf.mxu3 }
 0x57d   : > { %v1341_v45 = vsel %vm254_vm0, %v1321_v33, -inf }
 0x584   : > { %v1324_v57 = vpop.f32.mrf.mxu3 }
 0x585   : > { %v1342_v48 = vsel %vm254_vm0, %v1324_v57, -inf }
 0x58c   : > { %v1327_v4 = vpop.f32.mrf.mxu3 }
 0x58d   : > { %v1343_v38 = vsel %vm254_vm0, %v1327_v4, -inf }
 0x58e   : > { %v1344_v16 = vmax.f32 %v1339_v43, %v1343_v38 }
 0x594   : > { %v1330_v34 = vpop.f32.mrf.mxu3 }
 0x595   : > { %v1345_v36 = vsel %vm254_vm0, %v1330_v34, -inf }
 0x596   : > { %v1346_v2 = vmax.f32 %v1340_v37, %v1345_v36 }
 0x598   : > { %v1351_v8 = vmax.f32 %v1344_v16, %v1346_v2 }
 0x59c   : > { %v1333_v35 = vpop.f32.mrf.mxu3 }
 0x59d   : > { %v1347_v39 = vsel %vm254_vm0, %v1333_v35, -inf }
 0x59e   : > { %v1348_v41 = vmax.f32 %v1341_v45, %v1347_v39 }
 0x5a4   : > { %v1336_v40 = vpop.f32.mrf.mxu3 }
 0x5a5   : > { %v1349_v3 = vsel %vm254_vm0, %v1336_v40, -inf }
 0x5a6   : > { %v1350_v42 = vmax.f32 %v1342_v48, %v1349_v3 }
 0x5a8   : > { %v1352_v1 = vmax.f32 %v1348_v41, %v1350_v42 }
 0x5aa   : > { %v1353_v0 = vmax.f32 %v1351_v8, %v1352_v1 }
 0x5ac   : > { %v1354_v44 = vrot.slane %v1353_v0, 4 }
 0x5ae   : > { %v1355_v46 = vmax.f32 %v1353_v0, %v1354_v44 }
 0x5b0   : > { %v1356_v24 = vrot.slane %v1355_v46, 2 }
 0x5b2   : > { %v1357_v47 = vmax.f32 %v1355_v46, %v1356_v24 }
 0x5b4   : > { %v1358_v49 = vrot.slane %v1357_v47, 1 }
 0x5b6   : > { %v1359_v50 = vmax.f32 %v1357_v47, %v1358_v49  ;;  %v1450_v47 = vld [vmem:[#allocation2 + $0x10] sm:$0xff]  ;;  %v1449_v49 = vld [vmem:[#allocation2 + $0x8] sm:$0xff] }
 0x5b8   : > { %v1360_v51 = vsub.f32 %v1315_v31, %v1359_v50  ;;  %v1361_v52 = vsub.f32 %v1318_v32, %v1359_v50  ;;  %v1362_v53 = vsub.f32 %v1321_v33, %v1359_v50  ;;  %v1363_v54 = vsub.f32 %v1324_v57, %v1359_v50 }
 0x5b9   : > { %v1364_v55 = vsub.f32 %v1327_v4, %v1359_v50  ;;  %v1365_v56 = vsub.f32 %v1330_v34, %v1359_v50  ;;  %v1367_v60 = vsub.f32 %v1336_v40, %v1359_v50  ;;  %v1366_v11 = vsub.f32 %v1333_v35, %v1359_v50  ;;  %v628_v4 = vpop.f32.mrf.mxu2  ;;  %v540_v34 = vpop.permute.xlu0 %539  ;;  %v1444_v50 = vld [vmem:[%s2344_s3] sm:$0xff] }
 0x5ba   : > { %v1368_v13 = vmul.f32 1.442695, %v1360_v51  ;;  %v1370_v58 = vmul.f32 1.442695, %v1361_v52  ;;  %v1372_v59 = vmul.f32 1.442695, %v1362_v53  ;;  %v629_v35 = vadd.f32 %v628_v4, %v540_v34 }
 0x5bb   : > { %v1374_v61 = vmul.f32 1.442695, %v1363_v54  ;;  %v1376_v62 = vmul.f32 1.442695, %v1364_v55  ;;  %v1378_v63 = vmul.f32 1.442695, %v1365_v56  ;;  %v1459_v55 = vpop.permute.xlu2 %1458 }
 0x5bc   : > { %1794 = vpow2.f32 %v1368_v13  ;;  %v1382_v7 = vmul.f32 1.442695, %v1367_v60  ;;  %v1380_v9 = vmul.f32 1.442695, %v1366_v11  ;;  %v1448_v51 = vld [vmem:[#allocation2] sm:$0xff]  ;;  %v1445_v52 = vld [vmem:[%s2344_s3 + $0x8] sm:$0xff]  ;;  %v1464_v60 = vpop.permute.xlu1 %1463 }
 0x5bd   : > { %1796 = vpow2.f32 %v1370_v58  ;;  %v1446_v53 = vld [vmem:[%s2344_s3 + $0x10] sm:$0xff]  ;;  %v1447_v54 = vld [vmem:[%s2344_s3 + $0x18] sm:$0xff]  ;;  %v1517_v13 = vld [vmem:[%s1967_s13] sm:$0xff] }
 0x5be   : > { %1798 = vpow2.f32 %v1372_v59  ;;  %v1518_v11 = vld [vmem:[%s1967_s13 + $0x8] sm:$0xff] }
 0x5bf   : > { %1800 = vpow2.f32 %v1374_v61 }
 0x5c0   : > { %1802 = vpow2.f32 %v1376_v62 }
 0x5c1   : > { %1804 = vpow2.f32 %v1378_v63 }
 0x5c2   : > { %v1795_v14 = vpop.eup %1794  ;;  %1806 = vpow2.f32 %v1382_v7 }
 0x5c3   : > { %v1797_v15 = vpop.eup %1796  ;;  %v1384_v17 = vsel %vm254_vm0, %v1795_v14, 0.0  ;;  %1808 = vpow2.f32 %v1380_v9 }
 0x5c4   : > { %v1799_v18 = vpop.eup %1798  ;;  %v1385_v19 = vsel %vm254_vm0, %v1797_v15, 0.0  ;;  %v1469_v7 = vpop.permute.xlu1 %1468 }
 0x5c5   : > { %v1801_v20 = vpop.eup %1800  ;;  %v1386_v6 = vadd.f32 %v1385_v19, %v1384_v17  ;;  %v1387_v12 = vsel %vm254_vm0, %v1799_v18, 0.0 }
 0x5c6   : > { %v1803_v5 = vpop.eup %1802  ;;  %v1389_v22 = vsel %vm254_vm0, %v1801_v20, 0.0 }
 0x5c7   : > { %v1388_v10 = vadd.f32 %v1387_v12, %v1386_v6  ;;  %v1805_v21 = vpop.eup %1804  ;;  %v1391_v26 = vsel %vm254_vm0, %v1803_v5, 0.0 }
 0x5c8   : > { %v1807_v23 = vpop.eup %1806  ;;  %v1393_v29 = vsel %vm254_vm0, %v1805_v21, 0.0 }
 0x5c9   : > { %v1390_v25 = vadd.f32 %v1389_v22, %v1388_v10  ;;  %1416 = vmatpush.msra.mxu1 %v1807_v23  ;;  %v1809_v27 = vpop.eup %1808  ;;  %v1397_v33 = vsel %vm254_vm0, %v1807_v23, 0.0 }
 0x5ca   : > { %v1395_v31 = vsel %vm254_vm0, %v1809_v27, 0.0 }
 0x5cb   : > { %v1392_v28 = vadd.f32 %v1391_v26, %v1390_v25  ;;  %1417 = vmatpush.msra.mxu1 %v1809_v27 }
 0x5cd   : > { %v1394_v30 = vadd.f32 %v1393_v29, %v1392_v28  ;;  %1418 = vmatpush.msra.mxu1 %v1805_v21 }
 0x5cf   : > { %v1396_v32 = vadd.f32 %v1395_v31, %v1394_v30  ;;  %1419 = vmatpush.msra.mxu1 %v1803_v5 }
 0x5d1   : > { %v1398_v57 = vadd.f32 %v1397_v33, %v1396_v32  ;;  %1420 = vmatpush.msra.mxu1 %v1801_v20  ;;  %v1520_v20 = vld [vmem:[%s1967_s13 + $0x18] sm:$0xff] }
 0x5d3   : > { %1421 = vmatpush.msra.mxu1 %v1799_v18  ;;  %v1399_v36 = vrot.slane %v1398_v57, 4  ;;  %v1474_v18 = vpop.permute.xlu1 %1473 }
 0x5d5   : > { %1422 = vmatpush.msra.mxu1 %v1797_v15  ;;  %v1400_v37 = vadd.f32 %v1399_v36, %v1398_v57 }
 0x5d7   : > { %1423 = vmatpush.msra.mxu1 %v1795_v14  ;;  %v1401_v38 = vrot.slane %v1400_v37, 2  ;;  %v1519_v14 = vld [vmem:[%s1967_s13 + $0x10] sm:$0xff] }
 0x5d8   : > { %1669 = vmatmul.msk.f32.vlgmr.msra.gmra.mxu1 %vm254_vm0, %v629_v35 }
 0x5d9   : > { %v1402_v39 = vadd.f32 %v1401_v38, %v1400_v37 }
 0x5db   : > { %v1403_v2 = vrot.slane %v1402_v39, 1 }
 0x5dd   : > { %v1404_v40 = vadd.f32 %v1403_v2, %v1402_v39 }
 0x5df   : > { %1810 = vrcp.f32 %v1404_v40  ;;  %v1439_v41 = vand.u32 2147483648, %v1404_v40  ;;  %vm1433_vm14 = vweird.f32 %v1404_v40  ;;  %v1437_v42 = vand.u32 2147483647, %v1404_v40 }
 0x5e1   : > { %v1440_v1 = vor.u32 1.1754944e-38, %v1439_v41  ;;  %vm1438_vm2 = vcmp.eq.f32.partialorder %v1437_v42, 8.507059e+37 }
 0x5e5   : > { %v1811_v43 = vpop.eup %1810 }
 0x5e6   : > { %v1429_v45 = vmul.f32 %v1811_v43, %v1404_v40  ;;  %vm1434_vm13 = vweird.f32 %v1811_v43 }
 0x5e7   : > { %vm1435_vm15 = vmor %vm1433_vm14, %vm1434_vm13 }
 0x5e8   : > { %v1430_v48 = vsub.f32 1.0, %v1429_v45 }
 0x5ea   : > { %v1431_v3 = vmul.f32 %v1811_v43, %v1430_v48 }
 0x5ec   : > { %v1432_v16 = vadd.f32 %v1811_v43, %v1431_v3 }
 0x5ee   : > { %v1436_v8 = vsel %vm1435_vm15, %v1811_v43, %v1432_v16 }
 0x5ef   : > { %v1441_v44 = vsel %vm1438_vm2, %v1440_v1, %v1436_v8 }
 0x655   : > { %v1425_v0 = vpop.f32.mrf.mxu1 }
 0x656   : > { %v1442_v46 = vmul.f32 %v1441_v44, %v1425_v0 }
 0x658   : > { %1443 = vst.msk [vmem:[#allocation2 + $0x18] sm:$0xff] %vm254_vm0, %v1442_v46 }
 0x65f   : > { %v1451_v24 = vld [vmem:[#allocation2 + $0x18] sm:$0xff] }
 0x660   : > { %1500 = vmatpush.msrb.mxu2 %v1451_v24 }
 0x662   : > { %1501 = vmatpush.msrb.mxu2 %v1450_v47 }
 0x664   : > { %1502 = vmatpush.msrb.mxu2 %v1449_v49 }
 0x666   : > { %1503 = vmatpush.msrb.mxu2 %v1448_v51 }
 0x667   : > { %1670 = vmatmul.msk.f32.vlgmr.msrb.gmra.mxu2 %vm287_vm1, %v1444_v50 }
 0x66f   : > { %1671 = vmatmul.msk.f32.gmra.mxu2 %vm287_vm1, %v1445_v52 }
 0x677   : > { %1672 = vmatmul.msk.f32.gmra.mxu2 %vm287_vm1, %v1446_v53 }
 0x67f   : > { %1673 = vmatmul.msk.f32.gmra.mxu2 %vm287_vm1, %v1447_v54 }
 0x6ea   : > { %v1505_v56 = vpop.f32.mrf.mxu2 }
 0x6eb   : > { %v1506_v58 = vadd.f32 %v1505_v56, %v1459_v55 }
 0x6ed   : > { %v1521_v59 = vadd.f32 %v1517_v13, %v1506_v58 }
 0x6ef   : > { %1525 = vst.msk [vmem:[%s244_s18] sm:$0xff] %vm254_vm0, %v1521_v59 }
 0x6f2   : > { %v1508_v61 = vpop.f32.mrf.mxu2 }
 0x6f3   : > { %v1509_v62 = vadd.f32 %v1508_v61, %v1464_v60 }
 0x6f5   : > { %v1522_v63 = vadd.f32 %v1518_v11, %v1509_v62 }
 0x6f7   : > { %1526 = vst.msk [vmem:[%s244_s18 + $0x8] sm:$0xff] %vm254_vm0, %v1522_v63 }
 0x6fa   : > { %v1511_v9 = vpop.f32.mrf.mxu2 }
 0x6fb   : > { %v1512_v15 = vadd.f32 %v1511_v9, %v1469_v7 }
 0x6fd   : > { %v1523_v17 = vadd.f32 %v1519_v14, %v1512_v15 }
 0x6ff   : > { %1527 = vst.msk [vmem:[%s244_s18 + $0x10] sm:$0xff] %vm254_vm0, %v1523_v17 }
 0x702   : > { %v1514_v19 = vpop.f32.mrf.mxu2 }
 0x703   : > { %v1515_v6 = vadd.f32 %v1514_v19, %v1474_v18 }
 0x705   : > { %v1524_v12 = vadd.f32 %v1520_v20, %v1515_v6 }
 0x707   : > { %1528 = vst.msk [vmem:[%s244_s18 + $0x18] sm:$0xff] %vm254_vm0, %v1524_v12 }
 0x708   : > { %1839 = shalt.err (!%p1836_p3)
}
 0x709   : > { %s1877_s16 = smov 128   ;;  %s1878_s18 = smov 8  }
 0x70a   : > { %1686 = dma.vmem_to_hbm [thread:$0]  (%p1952_p5), %s1543_s29, 512, %s1545_s9, %s1530_s25, %s1877_s16, %s1877_s16, %s1878_s18  }
 0x70b PF: > { %p1692_p4 = scmp.ge.s32.totalorder %s1874_s24, 2  ;;  %s1559_s19 = sand.u32 1, %s1862_s21  }
 0x70c   : > { %s1560_s20 = scalar_lea.sflag [#allocation4], %s1559_s19 }
 0x70d   : > { %p1689_p7 = pnand %p1692_p4, %p1956_p6 }
 0x70f   : > { %p1690_p8 = pneg %p1689_p7 }
 0x711   : > { %1857 = dma.done.wait (%p1690_p8), %s1560_s20, 512  }
 0x712   : > { %1859 = vsyncadd (%p1690_p8), %s1560_s20, 4294966784  ;;  %p16_p9 = scmp.ge.s32.totalorder %s1939_s27, 4   ;;  %s2350_s21 = smov %s1866_s22 }
 0x713   : > { %s2351_s22 = smov %s1870_s23  ;;  %s2352_s23 = smov %s1950_s30 }
 0x714   : > { %s2353_s24 = smov %s1939_s27  ;;  %18 = sbr.rel (!%p16_p9) target bundleno = 3 (0x3), region = 79 }
 0x719   :  { %1566 = vsyncpa [#allocation4], 1 }
 0x71a   :  { %1568 = vsyncpa [#allocation4 + $0x1], 1 }

</bundles_post_ra>
